<compile_context>
chip_gen: v5e
topology: v5e:2x2
jax: 0.10.0
libtpu: 0.0.40
codegen_flags: <defaults>
</compile_context>

<pallas_src>
import math
import numpy as np
import jax
import jax.numpy as jnp
from jax import lax
from jax.experimental import pallas as pl
from jax.experimental.pallas import tpu as pltpu


# ------------------------------- kernel --------------------------------------

def make_fst_kernel(TB, S, F):
    eps = 1e-4
    FS = F * S                      # slab width (== S * F)

    def kernel(x_ref, alpha_ref, ms_ref, vs_ref, mf_ref, vf_ref, out_ref, hbuf):

        def branch(xin, bkron, w1k, w2k, pool, vecs, alpha, T, H):
            # xin: (TB, T*H) slab, lane = t*H + h.  All weights are
            # block-diagonal kron(I_T, .), so one matmul == T per-row Linears.
            bx = jnp.dot(xin, bkron, preferred_element_type=jnp.float32)  # (TB, T*2H)

            # ---- LRU recurrence, fully unrolled (T is 8 or 16) ------------
            a = jnp.broadcast_to(vecs[0:1, 0:H], (TB, H))    # Re(lam)
            b = jnp.broadcast_to(vecs[1:2, 0:H], (TB, H))    # Im(lam)
            hr = jnp.broadcast_to(vecs[2:3, 0:H], (TB, H))   # Re(h0)
            hi = jnp.broadcast_to(vecs[3:4, 0:H], (TB, H))   # Im(h0)
            for t in range(T):                               # static unroll
                base = 2 * H * t
                nr = a * hr - b * hi + bx[:, base:base + H]
                ni = a * hi + b * hr + bx[:, base + H:base + 2 * H]
                hbuf[:, t * H:(t + 1) * H] = nr              # output = Re(h_t)
                hr, hi = nr, ni
            h = hbuf[...]                                    # (TB, T*H)

            # ---- Linear -> ReLU -> Dropout(identity) -> Linear -------------
            z = jnp.maximum(
                jnp.dot(h, w1k, preferred_element_type=jnp.float32)
                + vecs[4:5, :], 0.0)
            z = jnp.dot(z, w2k, preferred_element_type=jnp.float32) + vecs[5:6, :]

            # ---- gated skip + LayerNorm over each H-lane group --------------
            z = alpha * z + (1.0 - alpha) * xin
            mu = jnp.dot(z, pool, preferred_element_type=jnp.float32)
            d = z - mu
            var = jnp.dot(d * d, pool, preferred_element_type=jnp.float32)
            return d * lax.rsqrt(var + eps) * vecs[6:7, :] + vecs[7:8, :]

        ass = alpha_ref[0]          # sigmoid(alpha_seq_skip)
        afs = alpha_ref[1]          # sigmoid(alpha_fea_skip)

        # ---- sequence branch: hidden S, "time" axis F, lanes f*S + s --------
        z_s = branch(x_ref[...],
                     ms_ref[:, 0:2 * FS], ms_ref[:, 2 * FS:3 * FS],
                     ms_ref[:, 3 * FS:4 * FS], ms_ref[:, 4 * FS:5 * FS],
                     vs_ref, ass, F, S)

        # ---- branch transition: lane perm (f,s) -> (s,f) via one MXU matmul -
        xf = jnp.dot(z_s, mf_ref[:, 0:FS], preferred_element_type=jnp.float32)

        # ---- feature branch: hidden F, "time" axis S, lanes s*F + f ---------
        z_f = branch(xf,
                     mf_ref[:, FS:3 * FS], mf_ref[:, 3 * FS:4 * FS],
                     mf_ref[:, 4 * FS:5 * FS], mf_ref[:, 5 * FS:6 * FS],
                     vf_ref, afs, S, F)

        out_ref[...] = z_f          # (TB, S*F): single lane-dense store

    return kernel


# ------------------------- parameter initialization --------------------------

def init_lru(key, input_size, hid):
    k = jax.random.split(key, 6)
    B_real = jax.random.normal(k[0], (input_size, hid), jnp.float32)
    B_img = jax.random.normal(k[1], (input_size, hid), jnp.float32)
    u = jax.random.uniform(k[2], (hid,), jnp.float32, 0.999, 1.0)
    nu = jnp.log(-jnp.log(u))
    theta = jax.random.uniform(k[3], (hid,), jnp.float32, 0.0, math.pi / 10)
    delta = jnp.sqrt(1.0 - jnp.exp(-jnp.exp(nu)))
    h0_real = jax.random.normal(k[4], (hid,), jnp.float32)
    h0_img = jax.random.normal(k[5], (hid,), jnp.float32)
    mod = jnp.exp(-jnp.exp(nu))                       # |lam|
    lam_a = mod * jnp.cos(theta)                      # Re(lam)
    lam_b = mod * jnp.sin(theta)                      # Im(lam)
    return dict(B_real=B_real, B_img=B_img, delta=delta[None, :],
                lam_a=lam_a[None, :], lam_b=lam_b[None, :],
                h0_real=h0_real[None, :], h0_img=h0_img[None, :])


def init_linear(key, n_in, n_out):
    k1, k2 = jax.random.split(key)
    bound = 1.0 / math.sqrt(n_in)
    # stored already transposed: (in, out) so the kernel does x @ W + b
    W = jax.random.uniform(k1, (n_in, n_out), jnp.float32, -bound, bound)
    b = jax.random.uniform(k2, (1, n_out), jnp.float32, -bound, bound)
    return W, b


# --------------------------- host-side param packing -------------------------

def _blockdiag(T, W):
    return jnp.kron(jnp.eye(T, dtype=jnp.float32), W.astype(jnp.float32))


def _pack_mats(Bcat, W1, W2, T, H):
    # [ kron(I,Bcat) | kron(I,W1) | kron(I,W2) | kron(I, 11^T/H) ]
    return jnp.concatenate([
        _blockdiag(T, Bcat),
        _blockdiag(T, W1),
        _blockdiag(T, W2),
        _blockdiag(T, jnp.full((H, H), 1.0 / H, jnp.float32)),
    ], axis=1)


def _pack_vecs(lru, b1, b2, gamma, beta, T, H):
    FS = T * H

    def lane_pad(v):
        v = jnp.asarray(v, jnp.float32).reshape(1, -1)
        return jnp.pad(v, ((0, 0), (0, FS - v.shape[1])))

    def lane_tile(v):
        return jnp.tile(jnp.asarray(v, jnp.float32).reshape(1, -1), (1, T))

    return jnp.concatenate([
        lane_pad(lru['lam_a']), lane_pad(lru['lam_b']),
        lane_pad(lru['h0_real']), lane_pad(lru['h0_img']),
        lane_tile(b1), lane_tile(b2), lane_tile(gamma), lane_tile(beta),
    ], axis=0)                                          # (8, T*H)


def _perm_matrix(F, S):
    # lane f*S + s  ->  lane s*F + f   (the x.transpose(1,2) between branches)
    p = np.zeros((F * S, S * F), np.float32)
    src = np.arange(F * S)
    f, s = src // S, src % S
    p[src, s * F + f] = 1.0
    return jnp.asarray(p)


def _num_batch_blocks(B):
    # v7x has 2 TensorCores per chip -> split the batch into two "parallel"
    # grid blocks there; v5e / v6e are single-core, where a single grid step
    # avoids per-step pipeline overhead on this latency-bound kernel.
    try:
        kind = jax.devices()[0].device_kind.lower()
    except Exception:
        kind = ""
    if "v7" in kind and B % 2 == 0 and (B // 2) % 8 == 0:
        return 2
    return 1


# ------------------------------ pallas wrapper --------------------------------

def fst_forward_pallas(x, P, num_blocks=None):
    B, S, F = x.shape
    FS = F * S
    nb = _num_batch_blocks(B) if num_blocks is None else num_blocks
    assert B % nb == 0, "batch must divide evenly into batch blocks"
    TB = B // nb
    assert TB == B or TB % 8 == 0, "batch block must be a multiple of 8"

    alphas = jnp.stack([jax.nn.sigmoid(P['alpha_seq_skip']),
                        jax.nn.sigmoid(P['alpha_fea_skip'])]).astype(jnp.float32)

    sl, fl = P['seq_lru'], P['fea_lru']
    # fold delta into the fused (real | imag) LRU input projection (exact)
    bs_cat = jnp.concatenate([sl['B_real'] * sl['delta'],
                              sl['B_img'] * sl['delta']], axis=1)      # (S, 2S)
    bf_cat = jnp.concatenate([fl['B_real'] * fl['delta'],
                              fl['B_img'] * fl['delta']], axis=1)      # (F, 2F)

    mats_s = _pack_mats(bs_cat, P['seq_W1'], P['seq_W2'], F, S)        # (FS, 5*FS)
    mats_f = jnp.concatenate(
        [_perm_matrix(F, S),
         _pack_mats(bf_cat, P['fea_W1'], P['fea_W2'], S, F)], axis=1)  # (FS, 6*FS)
    vecs_s = _pack_vecs(sl, P['seq_b1'], P['seq_b2'],
                        P['ln_s_g'], P['ln_s_b'], F, S)                # (8, FS)
    vecs_f = _pack_vecs(fl, P['fea_b1'], P['fea_b2'],
                        P['ln_f_g'], P['ln_f_b'], S, F)                # (8, FS)

    # lane-dense input slab: row b = x[b].T flattened, lane index = f*S + s
    x_slab = jnp.swapaxes(x, 1, 2).reshape(B, FS)

    grid_spec = pltpu.PrefetchScalarGridSpec(
        num_scalar_prefetch=0,
        grid=(nb,),
        in_specs=[
            pl.BlockSpec((TB, FS), lambda i: (i, 0)),                  # x slab
            pl.BlockSpec(memory_space=pltpu.MemorySpace.SMEM),         # alphas
            pl.BlockSpec((FS, 5 * FS), lambda i: (0, 0)),              # mats_s
            pl.BlockSpec((8, FS), lambda i: (0, 0)),                   # vecs_s
            pl.BlockSpec((FS, 6 * FS), lambda i: (0, 0)),              # mats_f
            pl.BlockSpec((8, FS), lambda i: (0, 0)),                   # vecs_f
        ],
        out_specs=pl.BlockSpec((TB, FS), lambda i: (i, 0)),
        scratch_shapes=[pltpu.VMEM((TB, FS), jnp.float32)],            # scan buf
    )

    fn = pl.pallas_call(
        make_fst_kernel(TB, S, F),
        out_shape=jax.ShapeDtypeStruct((B, FS), jnp.float32),
        grid_spec=grid_spec,
        compiler_params=pltpu.CompilerParams(
            dimension_semantics=("parallel",)),
    )
    out2d = fn(x_slab, alphas, mats_s, vecs_s, mats_f, vecs_f)
    return out2d.reshape(B, S, F)


# ------------------------------ pure-JAX reference ----------------------------

def _lru_ref(x, p):
    bxr = jnp.einsum('btd,dh->bth', x, p['B_real']) * p['delta'][0]
    bxi = jnp.einsum('btd,dh->bth', x, p['B_img']) * p['delta'][0]
    a, b = p['lam_a'][0], p['lam_b'][0]
    B = x.shape[0]
    hr0 = jnp.broadcast_to(p['h0_real'][0], (B, a.shape[0]))
    hi0 = jnp.broadcast_to(p['h0_img'][0], (B, a.shape[0]))

    def step(carry, inp):
        hr, hi = carry
        br, bi = inp
        nr = a * hr - b * hi + br
        ni = a * hi + b * hr + bi
        return (nr, ni), nr

    _, outs = lax.scan(step, (hr0, hi0),
                       (jnp.swapaxes(bxr, 0, 1), jnp.swapaxes(bxi, 0, 1)))
    return jnp.swapaxes(outs, 0, 1)


def fst_forward_ref(x, P):
    eps = 1e-4
    ass = jax.nn.sigmoid(P['alpha_seq_skip'])
    afs = jax.nn.sigmoid(P['alpha_fea_skip'])

    xt = jnp.swapaxes(x, 1, 2)
    y = xt
    h = _lru_ref(xt, P['seq_lru'])
    z = jnp.maximum(h @ P['seq_W1'] + P['seq_b1'][0], 0.0)
    z = z @ P['seq_W2'] + P['seq_b2'][0]
    z = ass * z + (1 - ass) * y
    mu = z.mean(-1, keepdims=True)
    var = ((z - mu) ** 2).mean(-1, keepdims=True)
    z = (z - mu) / jnp.sqrt(var + eps) * P['ln_s_g'][0] + P['ln_s_b'][0]

    xf = jnp.swapaxes(z, 1, 2)
    y = xf
    h = _lru_ref(xf, P['fea_lru'])
    z = jnp.maximum(h @ P['fea_W1'] + P['fea_b1'][0], 0.0)
    z = z @ P['fea_W2'] + P['fea_b2'][0]
    z = afs * z + (1 - afs) * y
    mu = z.mean(-1, keepdims=True)
    var = ((z - mu) ** 2).mean(-1, keepdims=True)
    z = (z - mu) / jnp.sqrt(var + eps) * P['ln_f_g'][0] + P['ln_f_b'][0]
    return z


if __name__ == "__main__":
    B, S, F = 16, 16, 8   # batch, hid_seq_size, hid_feature_size
    key = jax.random.PRNGKey(0)
    keys = jax.random.split(key, 8)

    x = jax.random.normal(keys[0], (B, S, F), jnp.float32)

    seq_W1, seq_b1 = init_linear(keys[3], S, S)
    seq_W2, seq_b2 = init_linear(keys[4], S, S)
    fea_W1, fea_b1 = init_linear(keys[5], F, F)
    fea_W2, fea_b2 = init_linear(keys[6], F, F)

    P = dict(
        alpha_seq_skip=jnp.float32(0.0),
        alpha_fea_skip=jnp.float32(0.0),
        seq_lru=init_lru(keys[1], S, S),
        fea_lru=init_lru(keys[2], F, F),
        seq_W1=seq_W1, seq_b1=seq_b1, seq_W2=seq_W2, seq_b2=seq_b2,
        fea_W1=fea_W1, fea_b1=fea_b1, fea_W2=fea_W2, fea_b2=fea_b2,
        ln_s_g=jnp.ones((1, S), jnp.float32), ln_s_b=jnp.zeros((1, S), jnp.float32),
        ln_f_g=jnp.ones((1, F), jnp.float32), ln_f_b=jnp.zeros((1, F), jnp.float32),
    )

    out = jax.block_until_ready(fst_forward_pallas(x, P))
    ref = jax.block_until_ready(fst_forward_ref(x, P))

    assert out.shape == (B, S, F)
    err = float(np.max(np.abs(np.asarray(out) - np.asarray(ref))))
    assert np.allclose(np.asarray(out), np.asarray(ref), rtol=5e-3, atol=5e-3), err
    print("KERNEL_OK")
</pallas_src>

<mosaic_0001>
module attributes {stable_mosaic.version = 11 : i64} {
  func.func @kernel(%arg0: i32, %arg1: memref<16x128xf32, #tpu.memory_space<vmem>>, %arg2: memref<2xf32, #tpu.memory_space<smem>>, %arg3: memref<128x640xf32, #tpu.memory_space<vmem>>, %arg4: memref<8x128xf32, #tpu.memory_space<vmem>>, %arg5: memref<128x768xf32, #tpu.memory_space<vmem>>, %arg6: memref<8x128xf32, #tpu.memory_space<vmem>>, %arg7: memref<16x128xf32, #tpu.memory_space<vmem>>, %arg8: memref<16x128xf32, #tpu.memory_space<vmem>>) attributes {dimension_semantics = [#tpu.dimension_semantics<parallel>], iteration_bounds = array<i64: 1>, scalar_prefetch = 0 : i64, scratch_operands = 1 : i64, tpu.core_type = #tpu.core_type<tc>, window_params = [{transform_indices = @transform_0, window_bounds = array<i64: 16, 128>}, {transform_indices = @transform_1, window_bounds = array<i64: 2>}, {pipeline_mode = #tpu.pipeline_mode<synchronous>, transform_indices = @transform_2, window_bounds = array<i64: 128, 640>}, {pipeline_mode = #tpu.pipeline_mode<synchronous>, transform_indices = @transform_3, window_bounds = array<i64: 8, 128>}, {pipeline_mode = #tpu.pipeline_mode<synchronous>, transform_indices = @transform_4, window_bounds = array<i64: 128, 768>}, {pipeline_mode = #tpu.pipeline_mode<synchronous>, transform_indices = @transform_5, window_bounds = array<i64: 8, 128>}, {transform_indices = @transform_6, window_bounds = array<i64: 16, 128>}]} {
    %c0 = arith.constant 0 : index
    %0 = memref.load %arg2[%c0] : memref<2xf32, #tpu.memory_space<smem>>
    %c1 = arith.constant 1 : index
    %1 = memref.load %arg2[%c1] : memref<2xf32, #tpu.memory_space<smem>>
    %c0_0 = arith.constant 0 : index
    %c0_1 = arith.constant 0 : index
    %2 = vector.load %arg1[%c0_0, %c0_1] : memref<16x128xf32, #tpu.memory_space<vmem>>, vector<16x128xf32>
    %c0_2 = arith.constant 0 : index
    %c0_3 = arith.constant 0 : index
    %3 = vector.load %arg3[%c0_2, %c0_3] : memref<128x640xf32, #tpu.memory_space<vmem>>, vector<128x256xf32>
    %c0_4 = arith.constant 0 : index
    %c256 = arith.constant 256 : index
    %4 = vector.load %arg3[%c0_4, %c256] : memref<128x640xf32, #tpu.memory_space<vmem>>, vector<128x128xf32>
    %c0_5 = arith.constant 0 : index
    %c384 = arith.constant 384 : index
    %5 = vector.load %arg3[%c0_5, %c384] : memref<128x640xf32, #tpu.memory_space<vmem>>, vector<128x128xf32>
    %c0_6 = arith.constant 0 : index
    %c512 = arith.constant 512 : index
    %6 = vector.load %arg3[%c0_6, %c512] : memref<128x640xf32, #tpu.memory_space<vmem>>, vector<128x128xf32>
    %cst = arith.constant dense<0.000000e+00> : vector<16x256xf32>
    %7 = tpu.matmul %2, %3, %cst {dimension_numbers = #tpu.dot_dimension_numbers<[1], [0], [0], [1], [0, 0, 1, 1], [], []>} : vector<16x128xf32>, vector<128x256xf32>, vector<16x256xf32> -> vector<16x256xf32>
    %c0_7 = arith.constant 0 : index
    %c0_8 = arith.constant 0 : index
    %8 = vector.load %arg4[%c0_7, %c0_8] : memref<8x128xf32, #tpu.memory_space<vmem>>, vector<1x16xf32>
    %9 = vector.shape_cast %8 : vector<1x16xf32> to vector<1x16xf32>
    %10 = vector.broadcast %9 : vector<1x16xf32> to vector<16x16xf32>
    %c1_9 = arith.constant 1 : index
    %c0_10 = arith.constant 0 : index
    %11 = vector.load %arg4[%c1_9, %c0_10] : memref<8x128xf32, #tpu.memory_space<vmem>>, vector<1x16xf32>
    %12 = vector.shape_cast %11 : vector<1x16xf32> to vector<1x16xf32>
    %13 = vector.broadcast %12 : vector<1x16xf32> to vector<16x16xf32>
    %c2 = arith.constant 2 : index
    %c0_11 = arith.constant 0 : index
    %14 = vector.load %arg4[%c2, %c0_11] : memref<8x128xf32, #tpu.memory_space<vmem>>, vector<1x16xf32>
    %15 = vector.shape_cast %14 : vector<1x16xf32> to vector<1x16xf32>
    %16 = vector.broadcast %15 : vector<1x16xf32> to vector<16x16xf32>
    %c3 = arith.constant 3 : index
    %c0_12 = arith.constant 0 : index
    %17 = vector.load %arg4[%c3, %c0_12] : memref<8x128xf32, #tpu.memory_space<vmem>>, vector<1x16xf32>
    %18 = vector.shape_cast %17 : vector<1x16xf32> to vector<1x16xf32>
    %19 = vector.broadcast %18 : vector<1x16xf32> to vector<16x16xf32>
    %20 = arith.mulf %10, %16 : vector<16x16xf32>
    %21 = arith.mulf %13, %19 : vector<16x16xf32>
    %22 = arith.subf %20, %21 : vector<16x16xf32>
    %23 = vector.extract_strided_slice %7 {offsets = [0, 0], sizes = [16, 16], strides = [1, 1]} : vector<16x256xf32> to vector<16x16xf32>
    %24 = arith.addf %22, %23 : vector<16x16xf32>
    %25 = arith.mulf %10, %19 : vector<16x16xf32>
    %26 = arith.mulf %13, %16 : vector<16x16xf32>
    %27 = arith.addf %25, %26 : vector<16x16xf32>
    %28 = vector.extract_strided_slice %7 {offsets = [0, 16], sizes = [16, 16], strides = [1, 1]} : vector<16x256xf32> to vector<16x16xf32>
    %29 = arith.addf %27, %28 : vector<16x16xf32>
    %c0_13 = arith.constant 0 : index
    %c0_14 = arith.constant 0 : index
    %30 = vector.load %arg8[%c0_13, %c0_14] : memref<16x128xf32, #tpu.memory_space<vmem>>, vector<16x16xf32>
    tpu.vector_store %arg8[%c0_13, %c0_14], %24 {strides = array<i32>} : memref<16x128xf32, #tpu.memory_space<vmem>>, vector<16x16xf32>,
    %31 = arith.mulf %10, %24 : vector<16x16xf32>
    %32 = arith.mulf %13, %29 : vector<16x16xf32>
    %33 = arith.subf %31, %32 : vector<16x16xf32>
    %34 = vector.extract_strided_slice %7 {offsets = [0, 32], sizes = [16, 16], strides = [1, 1]} : vector<16x256xf32> to vector<16x16xf32>
    %35 = arith.addf %33, %34 : vector<16x16xf32>
    %36 = arith.mulf %10, %29 : vector<16x16xf32>
    %37 = arith.mulf %13, %24 : vector<16x16xf32>
    %38 = arith.addf %36, %37 : vector<16x16xf32>
    %39 = vector.extract_strided_slice %7 {offsets = [0, 48], sizes = [16, 16], strides = [1, 1]} : vector<16x256xf32> to vector<16x16xf32>
    %40 = arith.addf %38, %39 : vector<16x16xf32>
    %c0_15 = arith.constant 0 : index
    %c16 = arith.constant 16 : index
    %41 = vector.load %arg8[%c0_15, %c16] : memref<16x128xf32, #tpu.memory_space<vmem>>, vector<16x16xf32>
    tpu.vector_store %arg8[%c0_15, %c16], %35 {strides = array<i32>} : memref<16x128xf32, #tpu.memory_space<vmem>>, vector<16x16xf32>,
    %42 = arith.mulf %10, %35 : vector<16x16xf32>
    %43 = arith.mulf %13, %40 : vector<16x16xf32>
    %44 = arith.subf %42, %43 : vector<16x16xf32>
    %45 = vector.extract_strided_slice %7 {offsets = [0, 64], sizes = [16, 16], strides = [1, 1]} : vector<16x256xf32> to vector<16x16xf32>
    %46 = arith.addf %44, %45 : vector<16x16xf32>
    %47 = arith.mulf %10, %40 : vector<16x16xf32>
    %48 = arith.mulf %13, %35 : vector<16x16xf32>
    %49 = arith.addf %47, %48 : vector<16x16xf32>
    %50 = vector.extract_strided_slice %7 {offsets = [0, 80], sizes = [16, 16], strides = [1, 1]} : vector<16x256xf32> to vector<16x16xf32>
    %51 = arith.addf %49, %50 : vector<16x16xf32>
    %c0_16 = arith.constant 0 : index
    %c32 = arith.constant 32 : index
    %52 = vector.load %arg8[%c0_16, %c32] : memref<16x128xf32, #tpu.memory_space<vmem>>, vector<16x16xf32>
    tpu.vector_store %arg8[%c0_16, %c32], %46 {strides = array<i32>} : memref<16x128xf32, #tpu.memory_space<vmem>>, vector<16x16xf32>,
    %53 = arith.mulf %10, %46 : vector<16x16xf32>
    %54 = arith.mulf %13, %51 : vector<16x16xf32>
    %55 = arith.subf %53, %54 : vector<16x16xf32>
    %56 = vector.extract_strided_slice %7 {offsets = [0, 96], sizes = [16, 16], strides = [1, 1]} : vector<16x256xf32> to vector<16x16xf32>
    %57 = arith.addf %55, %56 : vector<16x16xf32>
    %58 = arith.mulf %10, %51 : vector<16x16xf32>
    %59 = arith.mulf %13, %46 : vector<16x16xf32>
    %60 = arith.addf %58, %59 : vector<16x16xf32>
    %61 = vector.extract_strided_slice %7 {offsets = [0, 112], sizes = [16, 16], strides = [1, 1]} : vector<16x256xf32> to vector<16x16xf32>
    %62 = arith.addf %60, %61 : vector<16x16xf32>
    %c0_17 = arith.constant 0 : index
    %c48 = arith.constant 48 : index
    %63 = vector.load %arg8[%c0_17, %c48] : memref<16x128xf32, #tpu.memory_space<vmem>>, vector<16x16xf32>
    tpu.vector_store %arg8[%c0_17, %c48], %57 {strides = array<i32>} : memref<16x128xf32, #tpu.memory_space<vmem>>, vector<16x16xf32>,
    %64 = arith.mulf %10, %57 : vector<16x16xf32>
    %65 = arith.mulf %13, %62 : vector<16x16xf32>
    %66 = arith.subf %64, %65 : vector<16x16xf32>
    %67 = vector.extract_strided_slice %7 {offsets = [0, 128], sizes = [16, 16], strides = [1, 1]} : vector<16x256xf32> to vector<16x16xf32>
    %68 = arith.addf %66, %67 : vector<16x16xf32>
    %69 = arith.mulf %10, %62 : vector<16x16xf32>
    %70 = arith.mulf %13, %57 : vector<16x16xf32>
    %71 = arith.addf %69, %70 : vector<16x16xf32>
    %72 = vector.extract_strided_slice %7 {offsets = [0, 144], sizes = [16, 16], strides = [1, 1]} : vector<16x256xf32> to vector<16x16xf32>
    %73 = arith.addf %71, %72 : vector<16x16xf32>
    %c0_18 = arith.constant 0 : index
    %c64 = arith.constant 64 : index
    %74 = vector.load %arg8[%c0_18, %c64] : memref<16x128xf32, #tpu.memory_space<vmem>>, vector<16x16xf32>
    tpu.vector_store %arg8[%c0_18, %c64], %68 {strides = array<i32>} : memref<16x128xf32, #tpu.memory_space<vmem>>, vector<16x16xf32>,
    %75 = arith.mulf %10, %68 : vector<16x16xf32>
    %76 = arith.mulf %13, %73 : vector<16x16xf32>
    %77 = arith.subf %75, %76 : vector<16x16xf32>
    %78 = vector.extract_strided_slice %7 {offsets = [0, 160], sizes = [16, 16], strides = [1, 1]} : vector<16x256xf32> to vector<16x16xf32>
    %79 = arith.addf %77, %78 : vector<16x16xf32>
    %80 = arith.mulf %10, %73 : vector<16x16xf32>
    %81 = arith.mulf %13, %68 : vector<16x16xf32>
    %82 = arith.addf %80, %81 : vector<16x16xf32>
    %83 = vector.extract_strided_slice %7 {offsets = [0, 176], sizes = [16, 16], strides = [1, 1]} : vector<16x256xf32> to vector<16x16xf32>
    %84 = arith.addf %82, %83 : vector<16x16xf32>
    %c0_19 = arith.constant 0 : index
    %c80 = arith.constant 80 : index
    %85 = vector.load %arg8[%c0_19, %c80] : memref<16x128xf32, #tpu.memory_space<vmem>>, vector<16x16xf32>
    tpu.vector_store %arg8[%c0_19, %c80], %79 {strides = array<i32>} : memref<16x128xf32, #tpu.memory_space<vmem>>, vector<16x16xf32>,
    %86 = arith.mulf %10, %79 : vector<16x16xf32>
    %87 = arith.mulf %13, %84 : vector<16x16xf32>
    %88 = arith.subf %86, %87 : vector<16x16xf32>
    %89 = vector.extract_strided_slice %7 {offsets = [0, 192], sizes = [16, 16], strides = [1, 1]} : vector<16x256xf32> to vector<16x16xf32>
    %90 = arith.addf %88, %89 : vector<16x16xf32>
    %91 = arith.mulf %10, %84 : vector<16x16xf32>
    %92 = arith.mulf %13, %79 : vector<16x16xf32>
    %93 = arith.addf %91, %92 : vector<16x16xf32>
    %94 = vector.extract_strided_slice %7 {offsets = [0, 208], sizes = [16, 16], strides = [1, 1]} : vector<16x256xf32> to vector<16x16xf32>
    %95 = arith.addf %93, %94 : vector<16x16xf32>
    %c0_20 = arith.constant 0 : index
    %c96 = arith.constant 96 : index
    %96 = vector.load %arg8[%c0_20, %c96] : memref<16x128xf32, #tpu.memory_space<vmem>>, vector<16x16xf32>
    tpu.vector_store %arg8[%c0_20, %c96], %90 {strides = array<i32>} : memref<16x128xf32, #tpu.memory_space<vmem>>, vector<16x16xf32>,
    %97 = arith.mulf %10, %90 : vector<16x16xf32>
    %98 = arith.mulf %13, %95 : vector<16x16xf32>
    %99 = arith.subf %97, %98 : vector<16x16xf32>
    %100 = vector.extract_strided_slice %7 {offsets = [0, 224], sizes = [16, 16], strides = [1, 1]} : vector<16x256xf32> to vector<16x16xf32>
    %101 = arith.addf %99, %100 : vector<16x16xf32>
    %c0_21 = arith.constant 0 : index
    %c112 = arith.constant 112 : index
    %102 = vector.load %arg8[%c0_21, %c112] : memref<16x128xf32, #tpu.memory_space<vmem>>, vector<16x16xf32>
    tpu.vector_store %arg8[%c0_21, %c112], %101 {strides = array<i32>} : memref<16x128xf32, #tpu.memory_space<vmem>>, vector<16x16xf32>,
    %c0_22 = arith.constant 0 : index
    %c0_23 = arith.constant 0 : index
    %103 = vector.load %arg8[%c0_22, %c0_23] : memref<16x128xf32, #tpu.memory_space<vmem>>, vector<16x128xf32>
    %cst_24 = arith.constant dense<0.000000e+00> : vector<16x128xf32>
    %104 = tpu.matmul %103, %4, %cst_24 {dimension_numbers = #tpu.dot_dimension_numbers<[1], [0], [0], [1], [0, 0, 1, 1], [], []>} : vector<16x128xf32>, vector<128x128xf32>, vector<16x128xf32> -> vector<16x128xf32>
    %c4 = arith.constant 4 : index
    %c0_25 = arith.constant 0 : index
    %105 = vector.load %arg4[%c4, %c0_25] : memref<8x128xf32, #tpu.memory_space<vmem>>, vector<1x128xf32>
    %106 = vector.broadcast %105 : vector<1x128xf32> to vector<16x128xf32>
    %107 = arith.addf %104, %106 : vector<16x128xf32>
    %cst_26 = arith.constant 0.000000e+00 : f32
    %108 = vector.broadcast %cst_26 : f32 to vector<16x128xf32>
    %109 = arith.maximumf %107, %108 : vector<16x128xf32>
    %cst_27 = arith.constant dense<0.000000e+00> : vector<16x128xf32>
    %110 = tpu.matmul %109, %5, %cst_27 {dimension_numbers = #tpu.dot_dimension_numbers<[1], [0], [0], [1], [0, 0, 1, 1], [], []>} : vector<16x128xf32>, vector<128x128xf32>, vector<16x128xf32> -> vector<16x128xf32>
    %c5 = arith.constant 5 : index
    %c0_28 = arith.constant 0 : index
    %111 = vector.load %arg4[%c5, %c0_28] : memref<8x128xf32, #tpu.memory_space<vmem>>, vector<1x128xf32>
    %112 = vector.broadcast %111 : vector<1x128xf32> to vector<16x128xf32>
    %113 = arith.addf %110, %112 : vector<16x128xf32>
    %114 = vector.broadcast %0 : f32 to vector<16x128xf32>
    %115 = arith.mulf %114, %113 : vector<16x128xf32>
    %cst_29 = arith.constant 1.000000e+00 : f32
    %116 = arith.subf %cst_29, %0 : f32
    %117 = vector.broadcast %116 : f32 to vector<16x128xf32>
    %118 = arith.mulf %117, %2 : vector<16x128xf32>
    %119 = arith.addf %115, %118 : vector<16x128xf32>
    %cst_30 = arith.constant dense<0.000000e+00> : vector<16x128xf32>
    %120 = tpu.matmul %119, %6, %cst_30 {dimension_numbers = #tpu.dot_dimension_numbers<[1], [0], [0], [1], [0, 0, 1, 1], [], []>} : vector<16x128xf32>, vector<128x128xf32>, vector<16x128xf32> -> vector<16x128xf32>
    %121 = arith.subf %119, %120 : vector<16x128xf32>
    %122 = arith.mulf %121, %121 : vector<16x128xf32>
    %cst_31 = arith.constant dense<0.000000e+00> : vector<16x128xf32>
    %123 = tpu.matmul %122, %6, %cst_31 {dimension_numbers = #tpu.dot_dimension_numbers<[1], [0], [0], [1], [0, 0, 1, 1], [], []>} : vector<16x128xf32>, vector<128x128xf32>, vector<16x128xf32> -> vector<16x128xf32>
    %cst_32 = arith.constant 9.99999974E-5 : f32
    %124 = vector.broadcast %cst_32 : f32 to vector<16x128xf32>
    %125 = arith.addf %123, %124 : vector<16x128xf32>
    %126 = math.rsqrt %125 : vector<16x128xf32>
    %127 = arith.mulf %121, %126 : vector<16x128xf32>
    %c6 = arith.constant 6 : index
    %c0_33 = arith.constant 0 : index
    %128 = vector.load %arg4[%c6, %c0_33] : memref<8x128xf32, #tpu.memory_space<vmem>>, vector<1x128xf32>
    %129 = vector.broadcast %128 : vector<1x128xf32> to vector<16x128xf32>
    %130 = arith.mulf %127, %129 : vector<16x128xf32>
    %c7 = arith.constant 7 : index
    %c0_34 = arith.constant 0 : index
    %131 = vector.load %arg4[%c7, %c0_34] : memref<8x128xf32, #tpu.memory_space<vmem>>, vector<1x128xf32>
    %132 = vector.broadcast %131 : vector<1x128xf32> to vector<16x128xf32>
    %133 = arith.addf %130, %132 : vector<16x128xf32>
    %c0_35 = arith.constant 0 : index
    %c0_36 = arith.constant 0 : index
    %134 = vector.load %arg5[%c0_35, %c0_36] : memref<128x768xf32, #tpu.memory_space<vmem>>, vector<128x128xf32>
    %cst_37 = arith.constant dense<0.000000e+00> : vector<16x128xf32>
    %135 = tpu.matmul %133, %134, %cst_37 {dimension_numbers = #tpu.dot_dimension_numbers<[1], [0], [0], [1], [0, 0, 1, 1], [], []>} : vector<16x128xf32>, vector<128x128xf32>, vector<16x128xf32> -> vector<16x128xf32>
    %c0_38 = arith.constant 0 : index
    %c128 = arith.constant 128 : index
    %136 = vector.load %arg5[%c0_38, %c128] : memref<128x768xf32, #tpu.memory_space<vmem>>, vector<128x256xf32>
    %c0_39 = arith.constant 0 : index
    %c384_40 = arith.constant 384 : index
    %137 = vector.load %arg5[%c0_39, %c384_40] : memref<128x768xf32, #tpu.memory_space<vmem>>, vector<128x128xf32>
    %c0_41 = arith.constant 0 : index
    %c512_42 = arith.constant 512 : index
    %138 = vector.load %arg5[%c0_41, %c512_42] : memref<128x768xf32, #tpu.memory_space<vmem>>, vector<128x128xf32>
    %c0_43 = arith.constant 0 : index
    %c640 = arith.constant 640 : index
    %139 = vector.load %arg5[%c0_43, %c640] : memref<128x768xf32, #tpu.memory_space<vmem>>, vector<128x128xf32>
    %cst_44 = arith.constant dense<0.000000e+00> : vector<16x256xf32>
    %140 = tpu.matmul %135, %136, %cst_44 {dimension_numbers = #tpu.dot_dimension_numbers<[1], [0], [0], [1], [0, 0, 1, 1], [], []>} : vector<16x128xf32>, vector<128x256xf32>, vector<16x256xf32> -> vector<16x256xf32>
    %c0_45 = arith.constant 0 : index
    %c0_46 = arith.constant 0 : index
    %141 = vector.load %arg6[%c0_45, %c0_46] : memref<8x128xf32, #tpu.memory_space<vmem>>, vector<1x8xf32>
    %142 = vector.shape_cast %141 : vector<1x8xf32> to vector<1x8xf32>
    %143 = vector.broadcast %142 : vector<1x8xf32> to vector<16x8xf32>
    %c1_47 = arith.constant 1 : index
    %c0_48 = arith.constant 0 : index
    %144 = vector.load %arg6[%c1_47, %c0_48] : memref<8x128xf32, #tpu.memory_space<vmem>>, vector<1x8xf32>
    %145 = vector.shape_cast %144 : vector<1x8xf32> to vector<1x8xf32>
    %146 = vector.broadcast %145 : vector<1x8xf32> to vector<16x8xf32>
    %c2_49 = arith.constant 2 : index
    %c0_50 = arith.constant 0 : index
    %147 = vector.load %arg6[%c2_49, %c0_50] : memref<8x128xf32, #tpu.memory_space<vmem>>, vector<1x8xf32>
    %148 = vector.shape_cast %147 : vector<1x8xf32> to vector<1x8xf32>
    %149 = vector.broadcast %148 : vector<1x8xf32> to vector<16x8xf32>
    %c3_51 = arith.constant 3 : index
    %c0_52 = arith.constant 0 : index
    %150 = vector.load %arg6[%c3_51, %c0_52] : memref<8x128xf32, #tpu.memory_space<vmem>>, vector<1x8xf32>
    %151 = vector.shape_cast %150 : vector<1x8xf32> to vector<1x8xf32>
    %152 = vector.broadcast %151 : vector<1x8xf32> to vector<16x8xf32>
    %153 = arith.mulf %143, %149 : vector<16x8xf32>
    %154 = arith.mulf %146, %152 : vector<16x8xf32>
    %155 = arith.subf %153, %154 : vector<16x8xf32>
    %156 = vector.extract_strided_slice %140 {offsets = [0, 0], sizes = [16, 8], strides = [1, 1]} : vector<16x256xf32> to vector<16x8xf32>
    %157 = arith.addf %155, %156 : vector<16x8xf32>
    %158 = arith.mulf %143, %152 : vector<16x8xf32>
    %159 = arith.mulf %146, %149 : vector<16x8xf32>
    %160 = arith.addf %158, %159 : vector<16x8xf32>
    %161 = vector.extract_strided_slice %140 {offsets = [0, 8], sizes = [16, 8], strides = [1, 1]} : vector<16x256xf32> to vector<16x8xf32>
    %162 = arith.addf %160, %161 : vector<16x8xf32>
    %c0_53 = arith.constant 0 : index
    %c0_54 = arith.constant 0 : index
    %163 = vector.load %arg8[%c0_53, %c0_54] : memref<16x128xf32, #tpu.memory_space<vmem>>, vector<16x8xf32>
    tpu.vector_store %arg8[%c0_53, %c0_54], %157 {strides = array<i32>} : memref<16x128xf32, #tpu.memory_space<vmem>>, vector<16x8xf32>,
    %164 = arith.mulf %143, %157 : vector<16x8xf32>
    %165 = arith.mulf %146, %162 : vector<16x8xf32>
    %166 = arith.subf %164, %165 : vector<16x8xf32>
    %167 = vector.extract_strided_slice %140 {offsets = [0, 16], sizes = [16, 8], strides = [1, 1]} : vector<16x256xf32> to vector<16x8xf32>
    %168 = arith.addf %166, %167 : vector<16x8xf32>
    %169 = arith.mulf %143, %162 : vector<16x8xf32>
    %170 = arith.mulf %146, %157 : vector<16x8xf32>
    %171 = arith.addf %169, %170 : vector<16x8xf32>
    %172 = vector.extract_strided_slice %140 {offsets = [0, 24], sizes = [16, 8], strides = [1, 1]} : vector<16x256xf32> to vector<16x8xf32>
    %173 = arith.addf %171, %172 : vector<16x8xf32>
    %c0_55 = arith.constant 0 : index
    %c8 = arith.constant 8 : index
    %174 = vector.load %arg8[%c0_55, %c8] : memref<16x128xf32, #tpu.memory_space<vmem>>, vector<16x8xf32>
    tpu.vector_store %arg8[%c0_55, %c8], %168 {strides = array<i32>} : memref<16x128xf32, #tpu.memory_space<vmem>>, vector<16x8xf32>,
    %175 = arith.mulf %143, %168 : vector<16x8xf32>
    %176 = arith.mulf %146, %173 : vector<16x8xf32>
    %177 = arith.subf %175, %176 : vector<16x8xf32>
    %178 = vector.extract_strided_slice %140 {offsets = [0, 32], sizes = [16, 8], strides = [1, 1]} : vector<16x256xf32> to vector<16x8xf32>
    %179 = arith.addf %177, %178 : vector<16x8xf32>
    %180 = arith.mulf %143, %173 : vector<16x8xf32>
    %181 = arith.mulf %146, %168 : vector<16x8xf32>
    %182 = arith.addf %180, %181 : vector<16x8xf32>
    %183 = vector.extract_strided_slice %140 {offsets = [0, 40], sizes = [16, 8], strides = [1, 1]} : vector<16x256xf32> to vector<16x8xf32>
    %184 = arith.addf %182, %183 : vector<16x8xf32>
    %c0_56 = arith.constant 0 : index
    %c16_57 = arith.constant 16 : index
    %185 = vector.load %arg8[%c0_56, %c16_57] : memref<16x128xf32, #tpu.memory_space<vmem>>, vector<16x8xf32>
    tpu.vector_store %arg8[%c0_56, %c16_57], %179 {strides = array<i32>} : memref<16x128xf32, #tpu.memory_space<vmem>>, vector<16x8xf32>,
    %186 = arith.mulf %143, %179 : vector<16x8xf32>
    %187 = arith.mulf %146, %184 : vector<16x8xf32>
    %188 = arith.subf %186, %187 : vector<16x8xf32>
    %189 = vector.extract_strided_slice %140 {offsets = [0, 48], sizes = [16, 8], strides = [1, 1]} : vector<16x256xf32> to vector<16x8xf32>
    %190 = arith.addf %188, %189 : vector<16x8xf32>
    %191 = arith.mulf %143, %184 : vector<16x8xf32>
    %192 = arith.mulf %146, %179 : vector<16x8xf32>
    %193 = arith.addf %191, %192 : vector<16x8xf32>
    %194 = vector.extract_strided_slice %140 {offsets = [0, 56], sizes = [16, 8], strides = [1, 1]} : vector<16x256xf32> to vector<16x8xf32>
    %195 = arith.addf %193, %194 : vector<16x8xf32>
    %c0_58 = arith.constant 0 : index
    %c24 = arith.constant 24 : index
    %196 = vector.load %arg8[%c0_58, %c24] : memref<16x128xf32, #tpu.memory_space<vmem>>, vector<16x8xf32>
    tpu.vector_store %arg8[%c0_58, %c24], %190 {strides = array<i32>} : memref<16x128xf32, #tpu.memory_space<vmem>>, vector<16x8xf32>,
    %197 = arith.mulf %143, %190 : vector<16x8xf32>
    %198 = arith.mulf %146, %195 : vector<16x8xf32>
    %199 = arith.subf %197, %198 : vector<16x8xf32>
    %200 = vector.extract_strided_slice %140 {offsets = [0, 64], sizes = [16, 8], strides = [1, 1]} : vector<16x256xf32> to vector<16x8xf32>
    %201 = arith.addf %199, %200 : vector<16x8xf32>
    %202 = arith.mulf %143, %195 : vector<16x8xf32>
    %203 = arith.mulf %146, %190 : vector<16x8xf32>
    %204 = arith.addf %202, %203 : vector<16x8xf32>
    %205 = vector.extract_strided_slice %140 {offsets = [0, 72], sizes = [16, 8], strides = [1, 1]} : vector<16x256xf32> to vector<16x8xf32>
    %206 = arith.addf %204, %205 : vector<16x8xf32>
    %c0_59 = arith.constant 0 : index
    %c32_60 = arith.constant 32 : index
    %207 = vector.load %arg8[%c0_59, %c32_60] : memref<16x128xf32, #tpu.memory_space<vmem>>, vector<16x8xf32>
    tpu.vector_store %arg8[%c0_59, %c32_60], %201 {strides = array<i32>} : memref<16x128xf32, #tpu.memory_space<vmem>>, vector<16x8xf32>,
    %208 = arith.mulf %143, %201 : vector<16x8xf32>
    %209 = arith.mulf %146, %206 : vector<16x8xf32>
    %210 = arith.subf %208, %209 : vector<16x8xf32>
    %211 = vector.extract_strided_slice %140 {offsets = [0, 80], sizes = [16, 8], strides = [1, 1]} : vector<16x256xf32> to vector<16x8xf32>
    %212 = arith.addf %210, %211 : vector<16x8xf32>
    %213 = arith.mulf %143, %206 : vector<16x8xf32>
    %214 = arith.mulf %146, %201 : vector<16x8xf32>
    %215 = arith.addf %213, %214 : vector<16x8xf32>
    %216 = vector.extract_strided_slice %140 {offsets = [0, 88], sizes = [16, 8], strides = [1, 1]} : vector<16x256xf32> to vector<16x8xf32>
    %217 = arith.addf %215, %216 : vector<16x8xf32>
    %c0_61 = arith.constant 0 : index
    %c40 = arith.constant 40 : index
    %218 = vector.load %arg8[%c0_61, %c40] : memref<16x128xf32, #tpu.memory_space<vmem>>, vector<16x8xf32>
    tpu.vector_store %arg8[%c0_61, %c40], %212 {strides = array<i32>} : memref<16x128xf32, #tpu.memory_space<vmem>>, vector<16x8xf32>,
    %219 = arith.mulf %143, %212 : vector<16x8xf32>
    %220 = arith.mulf %146, %217 : vector<16x8xf32>
    %221 = arith.subf %219, %220 : vector<16x8xf32>
    %222 = vector.extract_strided_slice %140 {offsets = [0, 96], sizes = [16, 8], strides = [1, 1]} : vector<16x256xf32> to vector<16x8xf32>
    %223 = arith.addf %221, %222 : vector<16x8xf32>
    %224 = arith.mulf %143, %217 : vector<16x8xf32>
    %225 = arith.mulf %146, %212 : vector<16x8xf32>
    %226 = arith.addf %224, %225 : vector<16x8xf32>
    %227 = vector.extract_strided_slice %140 {offsets = [0, 104], sizes = [16, 8], strides = [1, 1]} : vector<16x256xf32> to vector<16x8xf32>
    %228 = arith.addf %226, %227 : vector<16x8xf32>
    %c0_62 = arith.constant 0 : index
    %c48_63 = arith.constant 48 : index
    %229 = vector.load %arg8[%c0_62, %c48_63] : memref<16x128xf32, #tpu.memory_space<vmem>>, vector<16x8xf32>
    tpu.vector_store %arg8[%c0_62, %c48_63], %223 {strides = array<i32>} : memref<16x128xf32, #tpu.memory_space<vmem>>, vector<16x8xf32>,
    %230 = arith.mulf %143, %223 : vector<16x8xf32>
    %231 = arith.mulf %146, %228 : vector<16x8xf32>
    %232 = arith.subf %230, %231 : vector<16x8xf32>
    %233 = vector.extract_strided_slice %140 {offsets = [0, 112], sizes = [16, 8], strides = [1, 1]} : vector<16x256xf32> to vector<16x8xf32>
    %234 = arith.addf %232, %233 : vector<16x8xf32>
    %235 = arith.mulf %143, %228 : vector<16x8xf32>
    %236 = arith.mulf %146, %223 : vector<16x8xf32>
    %237 = arith.addf %235, %236 : vector<16x8xf32>
    %238 = vector.extract_strided_slice %140 {offsets = [0, 120], sizes = [16, 8], strides = [1, 1]} : vector<16x256xf32> to vector<16x8xf32>
    %239 = arith.addf %237, %238 : vector<16x8xf32>
    %c0_64 = arith.constant 0 : index
    %c56 = arith.constant 56 : index
    %240 = vector.load %arg8[%c0_64, %c56] : memref<16x128xf32, #tpu.memory_space<vmem>>, vector<16x8xf32>
    tpu.vector_store %arg8[%c0_64, %c56], %234 {strides = array<i32>} : memref<16x128xf32, #tpu.memory_space<vmem>>, vector<16x8xf32>,
    %241 = arith.mulf %143, %234 : vector<16x8xf32>
    %242 = arith.mulf %146, %239 : vector<16x8xf32>
    %243 = arith.subf %241, %242 : vector<16x8xf32>
    %244 = vector.extract_strided_slice %140 {offsets = [0, 128], sizes = [16, 8], strides = [1, 1]} : vector<16x256xf32> to vector<16x8xf32>
    %245 = arith.addf %243, %244 : vector<16x8xf32>
    %246 = arith.mulf %143, %239 : vector<16x8xf32>
    %247 = arith.mulf %146, %234 : vector<16x8xf32>
    %248 = arith.addf %246, %247 : vector<16x8xf32>
    %249 = vector.extract_strided_slice %140 {offsets = [0, 136], sizes = [16, 8], strides = [1, 1]} : vector<16x256xf32> to vector<16x8xf32>
    %250 = arith.addf %248, %249 : vector<16x8xf32>
    %c0_65 = arith.constant 0 : index
    %c64_66 = arith.constant 64 : index
    %251 = vector.load %arg8[%c0_65, %c64_66] : memref<16x128xf32, #tpu.memory_space<vmem>>, vector<16x8xf32>
    tpu.vector_store %arg8[%c0_65, %c64_66], %245 {strides = array<i32>} : memref<16x128xf32, #tpu.memory_space<vmem>>, vector<16x8xf32>,
    %252 = arith.mulf %143, %245 : vector<16x8xf32>
    %253 = arith.mulf %146, %250 : vector<16x8xf32>
    %254 = arith.subf %252, %253 : vector<16x8xf32>
    %255 = vector.extract_strided_slice %140 {offsets = [0, 144], sizes = [16, 8], strides = [1, 1]} : vector<16x256xf32> to vector<16x8xf32>
    %256 = arith.addf %254, %255 : vector<16x8xf32>
    %257 = arith.mulf %143, %250 : vector<16x8xf32>
    %258 = arith.mulf %146, %245 : vector<16x8xf32>
    %259 = arith.addf %257, %258 : vector<16x8xf32>
    %260 = vector.extract_strided_slice %140 {offsets = [0, 152], sizes = [16, 8], strides = [1, 1]} : vector<16x256xf32> to vector<16x8xf32>
    %261 = arith.addf %259, %260 : vector<16x8xf32>
    %c0_67 = arith.constant 0 : index
    %c72 = arith.constant 72 : index
    %262 = vector.load %arg8[%c0_67, %c72] : memref<16x128xf32, #tpu.memory_space<vmem>>, vector<16x8xf32>
    tpu.vector_store %arg8[%c0_67, %c72], %256 {strides = array<i32>} : memref<16x128xf32, #tpu.memory_space<vmem>>, vector<16x8xf32>,
    %263 = arith.mulf %143, %256 : vector<16x8xf32>
    %264 = arith.mulf %146, %261 : vector<16x8xf32>
    %265 = arith.subf %263, %264 : vector<16x8xf32>
    %266 = vector.extract_strided_slice %140 {offsets = [0, 160], sizes = [16, 8], strides = [1, 1]} : vector<16x256xf32> to vector<16x8xf32>
    %267 = arith.addf %265, %266 : vector<16x8xf32>
    %268 = arith.mulf %143, %261 : vector<16x8xf32>
    %269 = arith.mulf %146, %256 : vector<16x8xf32>
    %270 = arith.addf %268, %269 : vector<16x8xf32>
    %271 = vector.extract_strided_slice %140 {offsets = [0, 168], sizes = [16, 8], strides = [1, 1]} : vector<16x256xf32> to vector<16x8xf32>
    %272 = arith.addf %270, %271 : vector<16x8xf32>
    %c0_68 = arith.constant 0 : index
    %c80_69 = arith.constant 80 : index
    %273 = vector.load %arg8[%c0_68, %c80_69] : memref<16x128xf32, #tpu.memory_space<vmem>>, vector<16x8xf32>
    tpu.vector_store %arg8[%c0_68, %c80_69], %267 {strides = array<i32>} : memref<16x128xf32, #tpu.memory_space<vmem>>, vector<16x8xf32>,
    %274 = arith.mulf %143, %267 : vector<16x8xf32>
    %275 = arith.mulf %146, %272 : vector<16x8xf32>
    %276 = arith.subf %274, %275 : vector<16x8xf32>
    %277 = vector.extract_strided_slice %140 {offsets = [0, 176], sizes = [16, 8], strides = [1, 1]} : vector<16x256xf32> to vector<16x8xf32>
    %278 = arith.addf %276, %277 : vector<16x8xf32>
    %279 = arith.mulf %143, %272 : vector<16x8xf32>
    %280 = arith.mulf %146, %267 : vector<16x8xf32>
    %281 = arith.addf %279, %280 : vector<16x8xf32>
    %282 = vector.extract_strided_slice %140 {offsets = [0, 184], sizes = [16, 8], strides = [1, 1]} : vector<16x256xf32> to vector<16x8xf32>
    %283 = arith.addf %281, %282 : vector<16x8xf32>
    %c0_70 = arith.constant 0 : index
    %c88 = arith.constant 88 : index
    %284 = vector.load %arg8[%c0_70, %c88] : memref<16x128xf32, #tpu.memory_space<vmem>>, vector<16x8xf32>
    tpu.vector_store %arg8[%c0_70, %c88], %278 {strides = array<i32>} : memref<16x128xf32, #tpu.memory_space<vmem>>, vector<16x8xf32>,
    %285 = arith.mulf %143, %278 : vector<16x8xf32>
    %286 = arith.mulf %146, %283 : vector<16x8xf32>
    %287 = arith.subf %285, %286 : vector<16x8xf32>
    %288 = vector.extract_strided_slice %140 {offsets = [0, 192], sizes = [16, 8], strides = [1, 1]} : vector<16x256xf32> to vector<16x8xf32>
    %289 = arith.addf %287, %288 : vector<16x8xf32>
    %290 = arith.mulf %143, %283 : vector<16x8xf32>
    %291 = arith.mulf %146, %278 : vector<16x8xf32>
    %292 = arith.addf %290, %291 : vector<16x8xf32>
    %293 = vector.extract_strided_slice %140 {offsets = [0, 200], sizes = [16, 8], strides = [1, 1]} : vector<16x256xf32> to vector<16x8xf32>
    %294 = arith.addf %292, %293 : vector<16x8xf32>
    %c0_71 = arith.constant 0 : index
    %c96_72 = arith.constant 96 : index
    %295 = vector.load %arg8[%c0_71, %c96_72] : memref<16x128xf32, #tpu.memory_space<vmem>>, vector<16x8xf32>
    tpu.vector_store %arg8[%c0_71, %c96_72], %289 {strides = array<i32>} : memref<16x128xf32, #tpu.memory_space<vmem>>, vector<16x8xf32>,
    %296 = arith.mulf %143, %289 : vector<16x8xf32>
    %297 = arith.mulf %146, %294 : vector<16x8xf32>
    %298 = arith.subf %296, %297 : vector<16x8xf32>
    %299 = vector.extract_strided_slice %140 {offsets = [0, 208], sizes = [16, 8], strides = [1, 1]} : vector<16x256xf32> to vector<16x8xf32>
    %300 = arith.addf %298, %299 : vector<16x8xf32>
    %301 = arith.mulf %143, %294 : vector<16x8xf32>
    %302 = arith.mulf %146, %289 : vector<16x8xf32>
    %303 = arith.addf %301, %302 : vector<16x8xf32>
    %304 = vector.extract_strided_slice %140 {offsets = [0, 216], sizes = [16, 8], strides = [1, 1]} : vector<16x256xf32> to vector<16x8xf32>
    %305 = arith.addf %303, %304 : vector<16x8xf32>
    %c0_73 = arith.constant 0 : index
    %c104 = arith.constant 104 : index
    %306 = vector.load %arg8[%c0_73, %c104] : memref<16x128xf32, #tpu.memory_space<vmem>>, vector<16x8xf32>
    tpu.vector_store %arg8[%c0_73, %c104], %300 {strides = array<i32>} : memref<16x128xf32, #tpu.memory_space<vmem>>, vector<16x8xf32>,
    %307 = arith.mulf %143, %300 : vector<16x8xf32>
    %308 = arith.mulf %146, %305 : vector<16x8xf32>
    %309 = arith.subf %307, %308 : vector<16x8xf32>
    %310 = vector.extract_strided_slice %140 {offsets = [0, 224], sizes = [16, 8], strides = [1, 1]} : vector<16x256xf32> to vector<16x8xf32>
    %311 = arith.addf %309, %310 : vector<16x8xf32>
    %312 = arith.mulf %143, %305 : vector<16x8xf32>
    %313 = arith.mulf %146, %300 : vector<16x8xf32>
    %314 = arith.addf %312, %313 : vector<16x8xf32>
    %315 = vector.extract_strided_slice %140 {offsets = [0, 232], sizes = [16, 8], strides = [1, 1]} : vector<16x256xf32> to vector<16x8xf32>
    %316 = arith.addf %314, %315 : vector<16x8xf32>
    %c0_74 = arith.constant 0 : index
    %c112_75 = arith.constant 112 : index
    %317 = vector.load %arg8[%c0_74, %c112_75] : memref<16x128xf32, #tpu.memory_space<vmem>>, vector<16x8xf32>
    tpu.vector_store %arg8[%c0_74, %c112_75], %311 {strides = array<i32>} : memref<16x128xf32, #tpu.memory_space<vmem>>, vector<16x8xf32>,
    %318 = arith.mulf %143, %311 : vector<16x8xf32>
    %319 = arith.mulf %146, %316 : vector<16x8xf32>
    %320 = arith.subf %318, %319 : vector<16x8xf32>
    %321 = vector.extract_strided_slice %140 {offsets = [0, 240], sizes = [16, 8], strides = [1, 1]} : vector<16x256xf32> to vector<16x8xf32>
    %322 = arith.addf %320, %321 : vector<16x8xf32>
    %c0_76 = arith.constant 0 : index
    %c120 = arith.constant 120 : index
    %323 = vector.load %arg8[%c0_76, %c120] : memref<16x128xf32, #tpu.memory_space<vmem>>, vector<16x8xf32>
    tpu.vector_store %arg8[%c0_76, %c120], %322 {strides = array<i32>} : memref<16x128xf32, #tpu.memory_space<vmem>>, vector<16x8xf32>,
    %c0_77 = arith.constant 0 : index
    %c0_78 = arith.constant 0 : index
    %324 = vector.load %arg8[%c0_77, %c0_78] : memref<16x128xf32, #tpu.memory_space<vmem>>, vector<16x128xf32>
    %cst_79 = arith.constant dense<0.000000e+00> : vector<16x128xf32>
    %325 = tpu.matmul %324, %137, %cst_79 {dimension_numbers = #tpu.dot_dimension_numbers<[1], [0], [0], [1], [0, 0, 1, 1], [], []>} : vector<16x128xf32>, vector<128x128xf32>, vector<16x128xf32> -> vector<16x128xf32>
    %c4_80 = arith.constant 4 : index
    %c0_81 = arith.constant 0 : index
    %326 = vector.load %arg6[%c4_80, %c0_81] : memref<8x128xf32, #tpu.memory_space<vmem>>, vector<1x128xf32>
    %327 = vector.broadcast %326 : vector<1x128xf32> to vector<16x128xf32>
    %328 = arith.addf %325, %327 : vector<16x128xf32>
    %cst_82 = arith.constant 0.000000e+00 : f32
    %329 = vector.broadcast %cst_82 : f32 to vector<16x128xf32>
    %330 = arith.maximumf %328, %329 : vector<16x128xf32>
    %cst_83 = arith.constant dense<0.000000e+00> : vector<16x128xf32>
    %331 = tpu.matmul %330, %138, %cst_83 {dimension_numbers = #tpu.dot_dimension_numbers<[1], [0], [0], [1], [0, 0, 1, 1], [], []>} : vector<16x128xf32>, vector<128x128xf32>, vector<16x128xf32> -> vector<16x128xf32>
    %c5_84 = arith.constant 5 : index
    %c0_85 = arith.constant 0 : index
    %332 = vector.load %arg6[%c5_84, %c0_85] : memref<8x128xf32, #tpu.memory_space<vmem>>, vector<1x128xf32>
    %333 = vector.broadcast %332 : vector<1x128xf32> to vector<16x128xf32>
    %334 = arith.addf %331, %333 : vector<16x128xf32>
    %335 = vector.broadcast %1 : f32 to vector<16x128xf32>
    %336 = arith.mulf %335, %334 : vector<16x128xf32>
    %cst_86 = arith.constant 1.000000e+00 : f32
    %337 = arith.subf %cst_86, %1 : f32
    %338 = vector.broadcast %337 : f32 to vector<16x128xf32>
    %339 = arith.mulf %338, %135 : vector<16x128xf32>
    %340 = arith.addf %336, %339 : vector<16x128xf32>
    %cst_87 = arith.constant dense<0.000000e+00> : vector<16x128xf32>
    %341 = tpu.matmul %340, %139, %cst_87 {dimension_numbers = #tpu.dot_dimension_numbers<[1], [0], [0], [1], [0, 0, 1, 1], [], []>} : vector<16x128xf32>, vector<128x128xf32>, vector<16x128xf32> -> vector<16x128xf32>
    %342 = arith.subf %340, %341 : vector<16x128xf32>
    %343 = arith.mulf %342, %342 : vector<16x128xf32>
    %cst_88 = arith.constant dense<0.000000e+00> : vector<16x128xf32>
    %344 = tpu.matmul %343, %139, %cst_88 {dimension_numbers = #tpu.dot_dimension_numbers<[1], [0], [0], [1], [0, 0, 1, 1], [], []>} : vector<16x128xf32>, vector<128x128xf32>, vector<16x128xf32> -> vector<16x128xf32>
    %cst_89 = arith.constant 9.99999974E-5 : f32
    %345 = vector.broadcast %cst_89 : f32 to vector<16x128xf32>
    %346 = arith.addf %344, %345 : vector<16x128xf32>
    %347 = math.rsqrt %346 : vector<16x128xf32>
    %348 = arith.mulf %342, %347 : vector<16x128xf32>
    %c6_90 = arith.constant 6 : index
    %c0_91 = arith.constant 0 : index
    %349 = vector.load %arg6[%c6_90, %c0_91] : memref<8x128xf32, #tpu.memory_space<vmem>>, vector<1x128xf32>
    %350 = vector.broadcast %349 : vector<1x128xf32> to vector<16x128xf32>
    %351 = arith.mulf %348, %350 : vector<16x128xf32>
    %c7_92 = arith.constant 7 : index
    %c0_93 = arith.constant 0 : index
    %352 = vector.load %arg6[%c7_92, %c0_93] : memref<8x128xf32, #tpu.memory_space<vmem>>, vector<1x128xf32>
    %353 = vector.broadcast %352 : vector<1x128xf32> to vector<16x128xf32>
    %354 = arith.addf %351, %353 : vector<16x128xf32>
    %c0_94 = arith.constant 0 : index
    %c0_95 = arith.constant 0 : index
    %355 = vector.load %arg7[%c0_94, %c0_95] : memref<16x128xf32, #tpu.memory_space<vmem>>, vector<16x128xf32>
    tpu.vector_store %arg7[%c0_94, %c0_95], %354 {strides = array<i32>} : memref<16x128xf32, #tpu.memory_space<vmem>>, vector<16x128xf32>,
    return
  }
  func.func @transform_0(%arg0: i32) -> (i32, i32) {
    %c0_i32 = arith.constant 0 : i32
    %c0_i32_0 = arith.constant 0 : i32
    return %arg0, %c0_i32 : i32, i32
  }
  func.func @transform_1(%arg0: i32) -> i32 {
    %c0_i32 = arith.constant 0 : i32
    %c0_i32_0 = arith.constant 0 : i32
    return %c0_i32 : i32
  }
  func.func @transform_2(%arg0: i32) -> (i32, i32) {
    %c0_i32 = arith.constant 0 : i32
    %c0_i32_0 = arith.constant 0 : i32
    %c0_i32_1 = arith.constant 0 : i32
    return %c0_i32, %c0_i32_0 : i32, i32
  }
  func.func @transform_3(%arg0: i32) -> (i32, i32) {
    %c0_i32 = arith.constant 0 : i32
    %c0_i32_0 = arith.constant 0 : i32
    %c0_i32_1 = arith.constant 0 : i32
    return %c0_i32, %c0_i32_0 : i32, i32
  }
  func.func @transform_4(%arg0: i32) -> (i32, i32) {
    %c0_i32 = arith.constant 0 : i32
    %c0_i32_0 = arith.constant 0 : i32
    %c0_i32_1 = arith.constant 0 : i32
    return %c0_i32, %c0_i32_0 : i32, i32
  }
  func.func @transform_5(%arg0: i32) -> (i32, i32) {
    %c0_i32 = arith.constant 0 : i32
    %c0_i32_0 = arith.constant 0 : i32
    %c0_i32_1 = arith.constant 0 : i32
    return %c0_i32, %c0_i32_0 : i32, i32
  }
  func.func @transform_6(%arg0: i32) -> (i32, i32) {
    %c0_i32 = arith.constant 0 : i32
    %c0_i32_0 = arith.constant 0 : i32
    return %arg0, %c0_i32 : i32, i32
  }
}

</mosaic_0001>

<bundles_post_ra>
// kernel: tpu_custom_call.1
= control target key start
LH: loop header
LB: loop body
LE: loop exit
PB: predicated region body
PF: predicated region fallthrough
CT: control target
= control target key end

     0   :  { %11 = vsyncpa [#allocation4], 0  ;;  %s2513_s0 = inlined_call_operand.hbm [shape: f32[16,128], index: 0, kind: input, shape index: {}]   ;;  %s2514_s1 = inlined_call_operand.hbm [shape: f32[2], index: 1, kind: input, shape index: {}]   ;;  %s2515_s2 = inlined_call_operand.hbm [shape: f32[128,640], index: 2, kind: input, shape index: {}]   ;;  %s2516_s3 = inlined_call_operand.hbm [shape: f32[8,128], index: 3, kind: input, shape index: {}]   ;;  %s2517_s4 = inlined_call_operand.hbm [shape: f32[128,768], index: 4, kind: input, shape index: {}]   ;;  %s2518_s5 = inlined_call_operand.hbm [shape: f32[8,128], index: 5, kind: input, shape index: {}]   ;;  %s2519_s6 = inlined_call_operand.hbm [shape: f32[16,128], index: 6, kind: output, shape index: {}]  }
   0x1   :  { %12 = vsyncpa [#allocation6], 0 }
   0x2   :  { %13 = vsyncpa [#allocation9], 0 }
   0x3   :  { %14 = vsyncpa [#allocation12], 0  ;;  %s42_s23 = sshll.u32 %s2515_s2, 4  ;;  %s43_s23 = int_to_ptr.hbm [resolvable:$true] %s42_s23 }
   0x4   :  { %15 = vsyncpa [#allocation5], 0  ;;  %s1828_s24 = smov [#allocation8]   ;;  %s66_s28 = sshll.u32 %s2517_s4, 4  ;;  %s67_s28 = int_to_ptr.hbm [resolvable:$true] %s66_s28 }
   0x5   :  { %s44_s25 = sshll.u32 %s1828_s24, 4  ;;  %s1829_s29 = smov 640   ;;  %s45_s25 = int_to_ptr.vmem [resolvable:$true] %s44_s25 }
   0x6   :  { %s1830_s30 = smov 40   ;;  %s1831_s7 = smov [#allocation11]  }
   0x7   :  { %50 = dma.hbm_to_vmem [thread:$0]  %s43_s23, 10240, %s45_s25, [#allocation9], %s1829_s29, %s1829_s29, %s1830_s30  }
   0x8   :  { %s68_s8 = sshll.u32 %s1831_s7, 4  ;;  %s1832_s9 = smov 768   ;;  %s69_s8 = int_to_ptr.vmem [resolvable:$true] %s68_s8 }
   0x9   :  { %s1833_s10 = smov 48   ;;  %s20_s12 = sshll.u32 %s2513_s0, 4  ;;  %s21_s12 = int_to_ptr.hbm [resolvable:$true] %s20_s12 }
   0xa   :  { %74 = dma.hbm_to_vmem [thread:$0]  %s67_s28, 12288, %s69_s8, [#allocation12], %s1832_s9, %s1832_s9, %s1833_s10  }
   0xb   :  { %s1834_s13 = smov [#allocation3]   ;;  %s34_s16 = sshll.u32 %s2514_s1, 4  ;;  %s35_s16 = int_to_ptr.hbm [resolvable:$true] %s34_s16 }
   0xc   :  { %s22_s14 = sshll.u32 %s1834_s13, 4  ;;  %s1835_s17 = smov 128   ;;  %s23_s14 = int_to_ptr.vmem [resolvable:$true] %s22_s14 }
   0xd   :  { %s1836_s18 = smov 8   ;;  %s1837_s19 = smov [#allocation7]  }
   0xe   :  { %28 = dma.hbm_to_vmem [thread:$0]  %s21_s12, 256, %s23_s14, [#allocation4], %s1835_s17, %s1835_s17, %s1836_s18  }
   0xf   :  { %37 = dma.hbm_to_smem %s35_s16, 16, %s1837_s19, [#allocation6]  }
  0x10   :  { %s56_s0 = sshll.u32 %s2516_s3, 4  ;;  %s1838_s22 = smov [#allocation10]   ;;  %s57_s0 = int_to_ptr.hbm [resolvable:$true] %s56_s0 }
  0x11   :  { %s58_s23 = sshll.u32 %s1838_s22, 4  ;;  %s80_s1 = sshll.u32 %s2518_s5, 4  ;;  %s59_s23 = int_to_ptr.vmem [resolvable:$true] %s58_s23  ;;  %s81_s1 = int_to_ptr.hbm [resolvable:$true] %s80_s1 }
  0x12   :  { %61 = dma.hbm_to_vmem [thread:$0]  %s57_s0, 128, %s59_s23, [#allocation9]  }
  0x13   :  { %s1839_s26 = smov [#allocation13]  }
  0x14   :  { %s82_s27 = sshll.u32 %s1839_s26, 4  ;;  %s83_s27 = int_to_ptr.vmem [resolvable:$true] %s82_s27 }
  0x15   :  { %85 = dma.hbm_to_vmem [thread:$0]  %s81_s1, 128, %s83_s27, [#allocation12]  }
  0x16   :  { %1818 = dma.done.wait [#allocation4], 256  }
  0x17   :  { %1819 = vsyncadd [#allocation4], 4294967040 }
  0x18   :  { %1820 = dma.done.wait [#allocation6], 16  }
  0x19   :  { %1821 = vsyncadd [#allocation6], 4294967280 }
  0x1a   :  { %1822 = dma.done.wait [#allocation9], 10368  }
  0x1b   :  { %1823 = vsyncadd [#allocation9], 4294956928 }
  0x1c   :  { %1824 = dma.done.wait [#allocation12], 12416  }
  0x1d   :  { %1825 = vsyncadd [#allocation12], 4294954880 }
  0x1e   :  { %110 = sfence }
  0x1f   :  { %v145_v0 = vld [vmem:[#allocation8 + $0x258] sm:$0xff]  ;;  %v143_v1 = vld [vmem:[#allocation8 + $0x230] sm:$0xff]  ;;  %v141_v2 = vld [vmem:[#allocation8 + $0x208] sm:$0xff]  ;;  %vm267_vm0 = vcmask 130048   ;;  %s1840_s3 = smov 64   ;;  %s1841_s5 = smov 80  }
  0x20   :  { %195 = vmatpush.msra.mxu0 %v145_v0  ;;  %v146_v3 = vld [vmem:[#allocation8 + $0x260] sm:$0xff]  ;;  %v144_v4 = vld [vmem:[#allocation8 + $0x238] sm:$0xff]  ;;  %v142_v6 = vld [vmem:[#allocation8 + $0x210] sm:$0xff]  ;;  %s1842_s28 = smov 112   ;;  %s1843_s29 = smov 96   ;;  %vm306_vm1 = vcmask 261248  }
  0x21   :  { %v139_v5 = vld [vmem:[#allocation8 + $0x1e0] sm:$0xff]  ;;  %218 = vmatpush.msra.mxu1 %v146_v3  ;;  %v137_v7 = vld [vmem:[#allocation8 + $0x1b8] sm:$0xff]  ;;  %v140_v8 = vld [vmem:[#allocation8 + $0x1e8] sm:$0xff]  ;;  %s1844_s7 = smov 32   ;;  %s1845_s8 = smov 16   ;;  %vm345_vm2 = vcmask 392448  }
  0x22   :  { %196 = vmatpush.msra.mxu0 %v143_v1  ;;  %v135_v9 = vld [vmem:[#allocation8 + $0x190] sm:$0xff]  ;;  %v138_v10 = vld [vmem:[#allocation8 + $0x1c0] sm:$0xff]  ;;  %v133_v11 = vld [vmem:[#allocation8 + $0x168] sm:$0xff]  ;;  %vm384_vm3 = vcmask 523648   ;;  %vm419_vm4 = vcmask 654848   ;;  %vm458_vm5 = vcmask 786048  }
  0x23   :  { %219 = vmatpush.msra.mxu1 %v144_v4  ;;  %v131_v12 = vld [vmem:[#allocation8 + $0x140] sm:$0xff]  ;;  %v136_v13 = vld [vmem:[#allocation8 + $0x198] sm:$0xff]  ;;  %v134_v14 = vld [vmem:[#allocation8 + $0x170] sm:$0xff]  ;;  %vm497_vm6 = vcmask 917248   ;;  %vm522_vm7 = vcmask 1048448   ;;  %s111_s9 = sld [smem:[#allocation7]] }
  0x24   :  { %197 = vmatpush.msra.mxu0 %v141_v2  ;;  %v129_v15 = vld [vmem:[#allocation8 + $0x118] sm:$0xff]  ;;  %v132_v16 = vld [vmem:[#allocation8 + $0x148] sm:$0xff]  ;;  %v127_v17 = vld [vmem:[#allocation8 + $0xf0] sm:$0xff]  ;;  %s1846_s11 = smov 72   ;;  %s1847_s12 = smov 104   ;;  %vm859_vm14 = vcmask 64512  }
  0x25   :  { %220 = vmatpush.msra.mxu1 %v142_v6  ;;  %v130_v18 = vld [vmem:[#allocation8 + $0x120] sm:$0xff]  ;;  %v125_v19 = vld [vmem:[#allocation8 + $0xc8] sm:$0xff]  ;;  %v128_v20 = vld [vmem:[#allocation8 + $0xf8] sm:$0xff]  ;;  %s1848_s13 = smov 120   ;;  %s1849_s14 = smov 88   ;;  %vm898_vm15 = vcmask 130112  }
  0x26   :  { %198 = vmatpush.msra.mxu0 %v139_v5  ;;  %v123_v21 = vld [vmem:[#allocation8 + $0xa0] sm:$0xff]  ;;  %v126_v22 = vld [vmem:[#allocation8 + $0xd0] sm:$0xff]  ;;  %v121_v23 = vld [vmem:[#allocation8 + $0x78] sm:$0xff]  ;;  %s1850_s4 = smov 56   ;;  %s1851_s15 = smov 24  }
  0x27   :  { %221 = vmatpush.msra.mxu1 %v140_v8  ;;  %v124_v24 = vld [vmem:[#allocation8 + $0xa8] sm:$0xff]  ;;  %v119_v25 = vld [vmem:[#allocation8 + $0x50] sm:$0xff]  ;;  %v122_v26 = vld [vmem:[#allocation8 + $0x80] sm:$0xff]  ;;  %s1852_s16 = smov [#allocation14]   ;;  %s1580_s0 = sshll.u32 %s2519_s6, 4  ;;  %s1581_s0 = int_to_ptr.hbm [resolvable:$true] %s1580_s0 }
  0x28   :  { %199 = vmatpush.msra.mxu0 %v137_v7  ;;  %v117_v27 = vld [vmem:[#allocation8 + $0x28] sm:$0xff]  ;;  %v120_v28 = vld [vmem:[#allocation8 + $0x58] sm:$0xff]  ;;  %v115_v29 = vld [vmem:[#allocation8] sm:$0xff]  ;;  %s1578_s19 = sshll.u32 %s1852_s16, 4  ;;  %s1579_s19 = int_to_ptr.vmem [resolvable:$true] %s1578_s19 }
  0x29   :  { %222 = vmatpush.msra.mxu1 %v138_v10  ;;  %v1911_v30 = vld [vmem:[#allocation3] sm:$0xff]  ;;  %v116_v32 = vld [vmem:[#allocation8 + $0x8] sm:$0xff]  ;;  %v1915_v33 = vld [vmem:[#allocation3 + $0x8] sm:$0xff]  ;;  %s582_s2 = ssub.f32 1.0, %s111_s9 }
  0x2a   :  { %200 = vmatpush.msra.mxu0 %v135_v9  ;;  %v118_v31 = vld [vmem:[#allocation8 + $0x30] sm:$0xff]  ;;  %v1919_v34 = vld [vmem:[#allocation10] ss:$0 sm:$0xff]  ;;  %v1921_v35 = vld [vmem:[#allocation10 + $0x1] ss:$0 sm:$0xff] }
  0x2b   :  { %223 = vmatpush.msra.mxu1 %v136_v13  ;;  %v1640_v36 = vld [vmem:[#allocation10 + $0x2] ss:$0 sm:$0xff]  ;;  %v1641_v37 = vld [vmem:[#allocation10 + $0x3] ss:$0 sm:$0xff] }
  0x2c   :  { %201 = vmatpush.msra.mxu0 %v133_v11  ;;  %v249_v38 = vmul.f32 %v1640_v36, %v1919_v34  ;;  %v250_v39 = vmul.f32 %v1641_v37, %v1921_v35  ;;  %v254_v48 = vmul.f32 %v1641_v37, %v1919_v34  ;;  %v255_v49 = vmul.f32 %v1640_v36, %v1921_v35 }
  0x2d   :  { %224 = vmatpush.msra.mxu1 %v134_v14 }
  0x2e   :  { %202 = vmatpush.msra.mxu0 %v131_v12  ;;  %v251_v40 = vsub.f32 %v249_v38, %v250_v39  ;;  %v256_v50 = vadd.f32 %v255_v49, %v254_v48 }
  0x2f   :  { %225 = vmatpush.msra.mxu1 %v132_v16 }
  0x30   :  { %203 = vmatpush.msra.mxu0 %v129_v15 }
  0x31   :  { %226 = vmatpush.msra.mxu1 %v130_v18 }
  0x32   :  { %204 = vmatpush.msra.mxu0 %v127_v17 }
  0x33   :  { %227 = vmatpush.msra.mxu1 %v128_v20 }
  0x34   :  { %205 = vmatpush.msra.mxu0 %v125_v19 }
  0x35   :  { %228 = vmatpush.msra.mxu1 %v126_v22 }
  0x36   :  { %206 = vmatpush.msra.mxu0 %v123_v21 }
  0x37   :  { %229 = vmatpush.msra.mxu1 %v124_v24 }
  0x38   :  { %207 = vmatpush.msra.mxu0 %v121_v23 }
  0x39   :  { %230 = vmatpush.msra.mxu1 %v122_v26 }
  0x3a   :  { %208 = vmatpush.msra.mxu0 %v119_v25 }
  0x3b   :  { %231 = vmatpush.msra.mxu1 %v120_v28 }
  0x3c   :  { %209 = vmatpush.msra.mxu0 %v117_v27 }
  0x3d   :  { %232 = vmatpush.msra.mxu1 %v118_v31 }
  0x3e   :  { %210 = vmatpush.msra.mxu0 %v115_v29 }
  0x3f   :  { %211 = vmatmul.f32.vlgmr.msra.gmra.mxu0 %v1911_v30  ;;  %233 = vmatpush.msra.mxu1 %v116_v32 }
  0x40   :  { %234 = vmatmul.f32.vlgmr.msra.gmra.mxu1 %v1911_v30 }
  0x47   :  { %214 = vmatmul.f32.gmra.mxu0 %v1915_v33 }
  0x48   :  { %237 = vmatmul.f32.gmra.mxu1 %v1915_v33 }
  0xbc   :  { %v212_v41 = vpop.f32.mrf.mxu0 }
  0xbd   :  { %315 = vrot.lane.b32.xlu2 %v212_v41, %s1840_s3  ;;  %290 = vrot.lane.b32.xlu1 %v212_v41, %s1841_s5  ;;  %v252_v42 = vadd.f32 %v251_v40, %v212_v41  ;;  %v1934_v45 = vpop.f32.mrf.mxu1 }
  0xbe   :  { %259 = vrot.lane.b32.xlu0 %v212_v41, %s1842_s28 }
  0xbf   :  { %268 = vst.msk [vmem:[#allocation2] sm:$0xff] %vm267_vm0, %v252_v42  ;;  %v286_v57 = vmul.f32 %v1921_v35, %v252_v42  ;;  %v270_v59 = vmul.f32 %v1919_v34, %v252_v42 }
  0xc4   :  { %v215_v43 = vpop.f32.mrf.mxu0 }
  0xc5   :  { %329 = vrot.lane.b32.xlu2 %v212_v41, %s1833_s10  ;;  %261 = vrot.lane.b32.xlu1 %v215_v43, %s1842_s28  ;;  %v1930_v44 = vadd.f32 %v251_v40, %v215_v43  ;;  %v1947_v46 = vpop.f32.mrf.mxu1 }
  0xc6   :  { %276 = vrot.lane.b32.xlu0 %v212_v41, %s1843_s29 }
  0xc7   :  { %269 = vst.msk [vmem:[#allocation2 + $0x8] sm:$0xff] %vm267_vm0, %v1930_v44  ;;  %v287_v32 = vmul.f32 %v1921_v35, %v1930_v44  ;;  %v271_v40 = vmul.f32 %v1919_v34, %v1930_v44  ;;  %vm937_vm0 = vcmask 195712  }
  0xcd   :  { %354 = vrot.lane.b32.xlu2 %v212_v41, %s1844_s7  ;;  %442 = vrot.lane.b32.xlu1 %v1934_v45, %s1841_s5 }
  0xce   :  { %368 = vrot.lane.b32.xlu0 %v212_v41, %s1845_s8 }
  0xd5   :  { %331 = vrot.lane.b32.xlu2 %v215_v43, %s1833_s10  ;;  %292 = vrot.lane.b32.xlu1 %v215_v43, %s1841_s5 }
  0xd6   :  { %403 = vrot.lane.b32.xlu0 %v1934_v45, %s1842_s28 }
  0xdd   :  { %370 = vrot.lane.b32.xlu2 %v215_v43, %s1845_s8  ;;  %317 = vrot.lane.b32.xlu1 %v215_v43, %s1840_s3 }
  0xde   :  { %278 = vrot.lane.b32.xlu0 %v215_v43, %s1843_s29 }
  0xe5   :  { %356 = vrot.lane.b32.xlu1 %v215_v43, %s1844_s7  ;;  %405 = vrot.lane.b32.xlu2 %v1947_v46, %s1842_s28 }
  0xe6   :  { %428 = vrot.lane.b32.xlu0 %v1934_v45, %s1843_s29 }
  0xed   :  { %481 = vrot.lane.b32.xlu1 %v1934_v45, %s1833_s10  ;;  %430 = vrot.lane.b32.xlu2 %v1947_v46, %s1843_s29 }
  0xee   :  { %467 = vrot.lane.b32.xlu0 %v1934_v45, %s1840_s3 }
  0xf5   :  { %506 = vrot.lane.b32.xlu1 %v1934_v45, %s1844_s7  ;;  %469 = vrot.lane.b32.xlu2 %v1947_v46, %s1840_s3 }
  0xf6   :  { %444 = vrot.lane.b32.xlu0 %v1947_v46, %s1841_s5 }
  0xfd   :  { %508 = vrot.lane.b32.xlu1 %v1947_v46, %s1844_s7 }
  0xfe   :  { %483 = vrot.lane.b32.xlu0 %v1947_v46, %s1833_s10 }
 0x117   :  { %v316_v47 = vpop.permute.xlu2 %315 }
 0x11f   :  { %v330_v54 = vpop.permute.xlu2 %329 }
 0x127   :  { %v355_v5 = vpop.permute.xlu2 %354 }
 0x12f   :  { %v291_v51 = vpop.permute.xlu1 %290  ;;  %v332_v21 = vpop.permute.xlu2 %331 }
 0x130   :  { %v260_v52 = vpop.permute.xlu0 %259 }
 0x131   :  { %v265_v53 = vadd.f32 %v260_v52, %v256_v50 }
 0x133   :  { %v272_v55 = vmul.f32 %v1921_v35, %v265_v53  ;;  %v284_v56 = vmul.f32 %v1919_v34, %v265_v53 }
 0x135   :  { %v288_v58 = vadd.f32 %v286_v57, %v284_v56  ;;  %v274_v61 = vsub.f32 %v270_v59, %v272_v55 }
 0x137   :  { %v296_v60 = vadd.f32 %v291_v51, %v288_v58  ;;  %v262_v62 = vpop.permute.xlu1 %261 }
 0x138   :  { %v277_v63 = vpop.permute.xlu0 %276  ;;  %v266_v18 = vadd.f32 %v262_v62, %v256_v50  ;;  %v371_v50 = vpop.permute.xlu2 %370 }
 0x139   :  { %v282_v0 = vadd.f32 %v277_v63, %v274_v61  ;;  %v311_v1 = vmul.f32 %v1921_v35, %v296_v60  ;;  %v323_v2 = vmul.f32 %v1919_v34, %v296_v60 }
 0x13a   :  { %v285_v27 = vmul.f32 %v1919_v34, %v266_v18  ;;  %v273_v36 = vmul.f32 %v1921_v35, %v266_v18 }
 0x13b   :  { %v309_v3 = vmul.f32 %v1919_v34, %v282_v0  ;;  %v325_v4 = vmul.f32 %v1921_v35, %v282_v0  ;;  %300 = vrot.lane.b32.xlu2 %v282_v0, %s1845_s8 }
 0x13c   :  { %v289_v39 = vadd.f32 %v287_v32, %v285_v27  ;;  %v275_v42 = vsub.f32 %v271_v40, %v273_v36 }
 0x13d   :  { %v313_v6 = vsub.f32 %v309_v3, %v311_v1  ;;  %v327_v7 = vadd.f32 %v325_v4, %v323_v2 }
 0x13f   :  { %v321_v8 = vadd.f32 %v316_v47, %v313_v6  ;;  %v335_v9 = vadd.f32 %v330_v54, %v327_v7  ;;  %v443_v10 = vpop.permute.xlu1 %442 }
 0x140   :  { %v369_v11 = vpop.permute.xlu0 %368 }
 0x141   :  { %v362_v12 = vmul.f32 %v1919_v34, %v335_v9  ;;  %v364_v13 = vmul.f32 %v1921_v35, %v321_v8  ;;  %339 = vrot.lane.b32.xlu0 %v321_v8, %s1844_s7  ;;  %v348_v14 = vmul.f32 %v1919_v34, %v321_v8  ;;  %v350_v15 = vmul.f32 %v1921_v35, %v335_v9 }
 0x143   :  { %v366_v16 = vadd.f32 %v364_v13, %v362_v12  ;;  %v352_v17 = vsub.f32 %v348_v14, %v350_v15 }
 0x145   :  { %v374_v19 = vadd.f32 %v369_v11, %v366_v16  ;;  %v360_v20 = vadd.f32 %v355_v5, %v352_v17  ;;  %v406_v5 = vpop.permute.xlu2 %405 }
 0x147   :  { %v389_v22 = vmul.f32 %v1921_v35, %v374_v19  ;;  %v395_v23 = vmul.f32 %v1919_v34, %v374_v19  ;;  %378 = vrot.lane.b32.xlu1 %v360_v20, %s1833_s10  ;;  %v397_v24 = vmul.f32 %v1921_v35, %v360_v20  ;;  %v293_v25 = vpop.permute.xlu1 %292  ;;  %v387_v26 = vmul.f32 %v1919_v34, %v360_v20 }
 0x148   :  { %v404_v28 = vpop.permute.xlu0 %403  ;;  %v297_v41 = vadd.f32 %v293_v25, %v289_v39 }
 0x149   :  { %v399_v29 = vadd.f32 %v397_v24, %v395_v23  ;;  %v391_v31 = vsub.f32 %v387_v26, %v389_v22 }
 0x14a   :  { %v312_v52 = vmul.f32 %v1921_v35, %v297_v41 }
 0x14b   :  { %v393_v37 = vadd.f32 %v391_v31, %v1934_v45  ;;  %v409_v38 = vadd.f32 %v404_v28, %v399_v29  ;;  %v324_v45 = vmul.f32 %v1919_v34, %v297_v41 }
 0x14d   :  { %413 = vrot.lane.b32.xlu2 %v393_v37, %s1840_s3  ;;  %v436_v47 = vmul.f32 %v1919_v34, %v409_v38  ;;  %v438_v48 = vmul.f32 %v1921_v35, %v393_v37  ;;  %v424_v53 = vmul.f32 %v1921_v35, %v409_v38  ;;  %v422_v55 = vmul.f32 %v1919_v34, %v393_v37  ;;  %v431_v29 = vpop.permute.xlu2 %430 }
 0x14f   :  { %v318_v43 = vpop.permute.xlu1 %317  ;;  %v440_v56 = vadd.f32 %v438_v48, %v436_v47  ;;  %v426_v60 = vsub.f32 %v422_v55, %v424_v53 }
 0x150   :  { %v279_v49 = vpop.permute.xlu0 %278 }
 0x151   :  { %v283_v51 = vadd.f32 %v279_v49, %v275_v42  ;;  %v448_v0 = vadd.f32 %v443_v10, %v440_v56 }
 0x153   :  { %v326_v54 = vmul.f32 %v1921_v35, %v283_v51  ;;  %v310_v44 = vmul.f32 %v1919_v34, %v283_v51  ;;  %302 = vrot.lane.b32.xlu0 %v283_v51, %s1845_s8  ;;  %v475_v11 = vmul.f32 %v1919_v34, %v448_v0  ;;  %v463_v13 = vmul.f32 %v1921_v35, %v448_v0  ;;  %v162_v0 = vld [vmem:[#allocation8 + $0x268] sm:$0xff] }
 0x154   :  { %529 = vmatpush.msra.mxu2 %v162_v0  ;;  %v183_v0 = vld [vmem:[#allocation8 + $0xc0] sm:$0xff] }
 0x155   :  { %v328_v57 = vadd.f32 %v326_v54, %v324_v45  ;;  %v314_v58 = vsub.f32 %v310_v44, %v312_v52  ;;  %v470_v53 = vpop.permute.xlu2 %469 }
 0x157   :  { %v322_v59 = vadd.f32 %v318_v43, %v314_v58  ;;  %v357_v61 = vpop.permute.xlu1 %356  ;;  %v336_v62 = vadd.f32 %v332_v21, %v328_v57 }
 0x158   :  { %v429_v63 = vpop.permute.xlu0 %428 }
 0x159   :  { %v365_v1 = vmul.f32 %v1921_v35, %v322_v59  ;;  %v434_v2 = vadd.f32 %v429_v63, %v426_v60  ;;  %v349_v3 = vmul.f32 %v1919_v34, %v322_v59  ;;  %v351_v4 = vmul.f32 %v1921_v35, %v336_v62  ;;  %341 = vrot.lane.b32.xlu1 %v322_v59, %s1844_s7 }
 0x15a   :  { %v363_v6 = vmul.f32 %v1919_v34, %v336_v62 }
 0x15b   :  { %v353_v7 = vsub.f32 %v349_v3, %v351_v4  ;;  %452 = vrot.lane.b32.xlu0 %v434_v2, %s1841_s5  ;;  %v461_v8 = vmul.f32 %v1919_v34, %v434_v2  ;;  %v477_v9 = vmul.f32 %v1921_v35, %v434_v2  ;;  %v160_v2 = vld [vmem:[#allocation8 + $0x218] sm:$0xff]  ;;  %v159_v3 = vld [vmem:[#allocation8 + $0x1f0] sm:$0xff]  ;;  %v158_v4 = vld [vmem:[#allocation8 + $0x1c8] sm:$0xff] }
 0x15c   :  { %v367_v10 = vadd.f32 %v365_v1, %v363_v6  ;;  %v161_v1 = vld [vmem:[#allocation8 + $0x240] sm:$0xff]  ;;  %v154_v6 = vld [vmem:[#allocation8 + $0x128] sm:$0xff] }
 0x15d   :  { %v361_v12 = vadd.f32 %v357_v61, %v353_v7  ;;  %v479_v15 = vadd.f32 %v477_v9, %v475_v11  ;;  %v465_v18 = vsub.f32 %v461_v8, %v463_v13  ;;  %530 = vmatpush.msra.mxu2 %v161_v1  ;;  %v153_v7 = vld [vmem:[#allocation8 + $0x100] sm:$0xff]  ;;  %v152_v8 = vld [vmem:[#allocation8 + $0xd8] sm:$0xff]  ;;  %v150_v11 = vld [vmem:[#allocation8 + $0x88] sm:$0xff] }
 0x15e   :  { %v375_v14 = vadd.f32 %v371_v50, %v367_v10  ;;  %v151_v10 = vld [vmem:[#allocation8 + $0xb0] sm:$0xff]  ;;  %v149_v13 = vld [vmem:[#allocation8 + $0x60] sm:$0xff] }
 0x15f   :  { %v388_v16 = vmul.f32 %v1919_v34, %v361_v12  ;;  %v398_v17 = vmul.f32 %v1921_v35, %v361_v12  ;;  %380 = vrot.lane.b32.xlu2 %v361_v12, %s1833_s10  ;;  %v482_v19 = vpop.permute.xlu1 %481  ;;  %531 = vmatpush.msra.mxu2 %v160_v2 }
 0x160   :  { %v396_v20 = vmul.f32 %v1919_v34, %v375_v14  ;;  %v468_v21 = vpop.permute.xlu0 %467  ;;  %v487_v22 = vadd.f32 %v482_v19, %v479_v15  ;;  %v390_v23 = vmul.f32 %v1921_v35, %v375_v14  ;;  %v148_v15 = vld [vmem:[#allocation8 + $0x38] sm:$0xff] }
 0x161   :  { %v473_v24 = vadd.f32 %v468_v21, %v465_v18  ;;  %532 = vmatpush.msra.mxu2 %v159_v3  ;;  %v178_v21 = vld [vmem:[#allocation8 + $0x270] sm:$0xff] }
 0x162   :  { %v400_v25 = vadd.f32 %v398_v17, %v396_v20  ;;  %v502_v26 = vmul.f32 %v1921_v35, %v487_v22  ;;  %v392_v27 = vsub.f32 %v388_v16, %v390_v23  ;;  %v147_v16 = vld [vmem:[#allocation8 + $0x10] sm:$0xff]  ;;  %v177_v22 = vld [vmem:[#allocation8 + $0x248] sm:$0xff]  ;;  %556 = vmatpush.msra.mxu3 %v178_v21 }
 0x163   :  { %v500_v28 = vmul.f32 %v1919_v34, %v473_v24  ;;  %491 = vrot.lane.b32.xlu1 %v473_v24, %s1843_s29  ;;  %533 = vmatpush.msra.mxu2 %v158_v4  ;;  %v182_v4 = vld [vmem:[#allocation8 + $0x98] sm:$0xff] }
 0x164   :  { %v410_v31 = vadd.f32 %v406_v5, %v400_v25  ;;  %v394_v32 = vadd.f32 %v392_v27, %v1947_v46  ;;  %v155_v5 = vld [vmem:[#allocation8 + $0x150] sm:$0xff]  ;;  %v176_v25 = vld [vmem:[#allocation8 + $0x220] sm:$0xff]  ;;  %557 = vmatpush.msra.mxu3 %v177_v22  ;;  %v175_v27 = vld [vmem:[#allocation8 + $0x1f8] sm:$0xff] }
 0x165   :  { %v504_v36 = vsub.f32 %v500_v28, %v502_v26  ;;  %v174_v28 = vld [vmem:[#allocation8 + $0x1d0] sm:$0xff] }
 0x166   :  { %v425_v37 = vmul.f32 %v1921_v35, %v410_v31  ;;  %v437_v38 = vmul.f32 %v1919_v34, %v410_v31  ;;  %415 = vrot.lane.b32.xlu0 %v394_v32, %s1840_s3  ;;  %v423_v39 = vmul.f32 %v1919_v34, %v394_v32  ;;  %v439_v40 = vmul.f32 %v1921_v35, %v394_v32 }
 0x167   :  { %v507_v41 = vpop.permute.xlu1 %506  ;;  %558 = vmatpush.msra.mxu3 %v176_v25 }
 0x168   :  { %v427_v42 = vsub.f32 %v423_v39, %v425_v37  ;;  %v445_v43 = vpop.permute.xlu0 %444  ;;  %v441_v47 = vadd.f32 %v439_v40, %v437_v38  ;;  %v512_v48 = vadd.f32 %v507_v41, %v504_v36  ;;  %v172_v36 = vld [vmem:[#allocation8 + $0x180] sm:$0xff]  ;;  %v171_v38 = vld [vmem:[#allocation8 + $0x158] sm:$0xff]  ;;  %v170_v39 = vld [vmem:[#allocation8 + $0x130] sm:$0xff] }
 0x169   :  { %559 = vmatpush.msra.mxu3 %v175_v27  ;;  %v169_v40 = vld [vmem:[#allocation8 + $0x108] sm:$0xff]  ;;  %v168_v41 = vld [vmem:[#allocation8 + $0xe0] sm:$0xff]  ;;  %v679_v27 = vld [vmem:[#allocation11 + $0x210] sm:$0xff] }
 0x16a   :  { %v435_v49 = vadd.f32 %v431_v29, %v427_v42  ;;  %v449_v50 = vadd.f32 %v445_v43, %v441_v47  ;;  %516 = vrot.lane.b32.xlu2 %v512_v48, %s1842_s28  ;;  %v173_v29 = vld [vmem:[#allocation8 + $0x1a8] sm:$0xff]  ;;  %v167_v42 = vld [vmem:[#allocation8 + $0xb8] sm:$0xff]  ;;  %v166_v43 = vld [vmem:[#allocation8 + $0x90] sm:$0xff] }
 0x16b   :  { %560 = vmatpush.msra.mxu3 %v174_v28  ;;  %v678_v28 = vld [vmem:[#allocation11 + $0x1e0] sm:$0xff] }
 0x16c   :  { %v464_v46 = vmul.f32 %v1921_v35, %v449_v50  ;;  %v476_v51 = vmul.f32 %v1919_v34, %v449_v50  ;;  %454 = vrot.lane.b32.xlu1 %v435_v49, %s1841_s5  ;;  %v462_v52 = vmul.f32 %v1919_v34, %v435_v49  ;;  %v478_v45 = vmul.f32 %v1921_v35, %v435_v49  ;;  %v165_v49 = vld [vmem:[#allocation8 + $0x68] sm:$0xff]  ;;  %v164_v50 = vld [vmem:[#allocation8 + $0x40] sm:$0xff] }
 0x16d   :  { %561 = vmatpush.msra.mxu3 %v173_v29  ;;  %v677_v29 = vld [vmem:[#allocation11 + $0x1b0] sm:$0xff] }
 0x16e   :  { %v466_v54 = vsub.f32 %v462_v52, %v464_v46  ;;  %v480_v44 = vadd.f32 %v478_v45, %v476_v51  ;;  %v163_v46 = vld [vmem:[#allocation8 + $0x18] sm:$0xff]  ;;  %v193_v52 = vld [vmem:[#allocation8 + $0x250] sm:$0xff]  ;;  %v192_v45 = vld [vmem:[#allocation8 + $0x228] sm:$0xff] }
 0x16f   :  { %v509_v60 = vpop.permute.xlu1 %508  ;;  %562 = vmatpush.msra.mxu3 %v172_v36  ;;  %v194_v51 = vld [vmem:[#allocation8 + $0x278] sm:$0xff]  ;;  %v674_v36 = vld [vmem:[#allocation11 + $0x120] sm:$0xff] }
 0x170   :  { %v474_v55 = vadd.f32 %v470_v53, %v466_v54  ;;  %v484_v56 = vpop.permute.xlu0 %483  ;;  %588 = vmatpush.msrb.mxu0 %v194_v51  ;;  %615 = vmatpush.msrb.mxu1 %v194_v51  ;;  %v1642_v53 = vld [vmem:[#allocation10 + $0x4] ss:$0 sm:$0xff] }
 0x171   :  { %v488_v57 = vadd.f32 %v484_v56, %v480_v44  ;;  %563 = vmatpush.msra.mxu3 %v171_v38  ;;  %v191_v54 = vld [vmem:[#allocation8 + $0x200] sm:$0xff]  ;;  %v672_v38 = vld [vmem:[#allocation11 + $0xc0] sm:$0xff] }
 0x172   :  { %493 = vrot.lane.b32.xlu2 %v474_v55, %s1843_s29  ;;  %v501_v58 = vmul.f32 %v1919_v34, %v474_v55  ;;  %v157_v34 = vld [vmem:[#allocation8 + $0x1a0] sm:$0xff]  ;;  %589 = vmatpush.msrb.mxu0 %v193_v52  ;;  %v190_v55 = vld [vmem:[#allocation8 + $0x1d8] sm:$0xff] }
 0x173   :  { %v503_v59 = vmul.f32 %v1921_v35, %v488_v57  ;;  %534 = vmatpush.msra.mxu2 %v157_v34  ;;  %v156_v35 = vld [vmem:[#allocation8 + $0x178] sm:$0xff]  ;;  %564 = vmatpush.msra.mxu3 %v170_v39  ;;  %v189_v57 = vld [vmem:[#allocation8 + $0x1b0] sm:$0xff] }
 0x174   :  { %616 = vmatpush.msrb.mxu1 %v193_v52  ;;  %590 = vmatpush.msrb.mxu0 %v192_v45  ;;  %v181_v34 = vld [vmem:[#allocation8 + $0x70] sm:$0xff]  ;;  %v671_v39 = vld [vmem:[#allocation11 + $0x90] sm:$0xff]  ;;  %v737_v52 = vld [vmem:[#allocation11 + $0x2d8] sm:$0xff] }
 0x175   :  { %v505_v61 = vsub.f32 %v501_v58, %v503_v59  ;;  %535 = vmatpush.msra.mxu2 %v156_v35  ;;  %565 = vmatpush.msra.mxu3 %v169_v40  ;;  %v188_v59 = vld [vmem:[#allocation8 + $0x188] sm:$0xff] }
 0x176   :  { %617 = vmatpush.msrb.mxu1 %v192_v45  ;;  %591 = vmatpush.msrb.mxu0 %v191_v54  ;;  %v180_v35 = vld [vmem:[#allocation8 + $0x48] sm:$0xff] }
 0x177   :  { %v513_v62 = vadd.f32 %v509_v60, %v505_v61  ;;  %536 = vmatpush.msra.mxu2 %v155_v5  ;;  %566 = vmatpush.msra.mxu3 %v168_v41  ;;  %v187_v60 = vld [vmem:[#allocation8 + $0x160] sm:$0xff]  ;;  %v186_v61 = vld [vmem:[#allocation8 + $0x138] sm:$0xff]  ;;  %v670_v40 = vld [vmem:[#allocation11 + $0x60] sm:$0xff] }
 0x178   :  { %618 = vmatpush.msrb.mxu1 %v191_v54  ;;  %592 = vmatpush.msrb.mxu0 %v190_v55  ;;  %v179_v5 = vld [vmem:[#allocation8 + $0x20] sm:$0xff]  ;;  %v669_v41 = vld [vmem:[#allocation11 + $0x30] sm:$0xff]  ;;  %v738_v45 = vld [vmem:[#allocation11 + $0x2e0] sm:$0xff] }
 0x179   :  { %518 = vrot.lane.b32.xlu0 %v513_v62, %s1842_s28  ;;  %537 = vmatpush.msra.mxu2 %v154_v6  ;;  %v185_v62 = vld [vmem:[#allocation8 + $0x110] sm:$0xff]  ;;  %v1643_v6 = vld [vmem:[#allocation10 + $0x5] ss:$0 sm:$0xff]  ;;  %v736_v54 = vld [vmem:[#allocation11 + $0x2b0] sm:$0xff] }
 0x17a   :  { %567 = vmatpush.msra.mxu3 %v167_v42  ;;  %619 = vmatpush.msrb.mxu1 %v190_v55  ;;  %v668_v42 = vld [vmem:[#allocation11] sm:$0xff]  ;;  %v733_v55 = vld [vmem:[#allocation11 + $0x278] sm:$0xff] }
 0x17b   :  { %538 = vmatpush.msra.mxu2 %v153_v7  ;;  %593 = vmatpush.msrb.mxu0 %v189_v57  ;;  %v583_v7 = vstv %s582_s2 }
 0x17c   :  { %568 = vmatpush.msra.mxu3 %v166_v43  ;;  %620 = vmatpush.msrb.mxu1 %v189_v57  ;;  %v2062_v57 = vld [vmem:[#allocation10 + $0x6] ss:$0 sm:$0xff] }
 0x17d   :  { %539 = vmatpush.msra.mxu2 %v152_v8  ;;  %594 = vmatpush.msrb.mxu0 %v188_v59 }
 0x17e   :  { %569 = vmatpush.msra.mxu3 %v165_v49  ;;  %621 = vmatpush.msrb.mxu1 %v188_v59  ;;  %v731_v59 = vld [vmem:[#allocation11 + $0x248] sm:$0xff] }
 0x17f   :  { %540 = vmatpush.msra.mxu2 %v151_v10  ;;  %595 = vmatpush.msrb.mxu0 %v187_v60  ;;  %v584_v10 = vmul.f32 %v583_v7, %v1911_v30 }
 0x180   :  { %570 = vmatpush.msra.mxu3 %v164_v50  ;;  %622 = vmatpush.msrb.mxu1 %v187_v60  ;;  %v732_v60 = vld [vmem:[#allocation11 + $0x250] sm:$0xff] }
 0x181   :  { %541 = vmatpush.msra.mxu2 %v150_v11  ;;  %596 = vmatpush.msrb.mxu0 %v186_v61 }
 0x182   :  { %571 = vmatpush.msra.mxu3 %v163_v46  ;;  %623 = vmatpush.msrb.mxu1 %v186_v61 }
 0x183   :  { %542 = vmatpush.msra.mxu2 %v149_v13  ;;  %597 = vmatpush.msrb.mxu0 %v185_v62 }
 0x184   :  { %624 = vmatpush.msrb.mxu1 %v185_v62  ;;  %787 = vmatpush.msrb.mxu3 %v737_v52 }
 0x185   :  { %543 = vmatpush.msra.mxu2 %v148_v15 }
 0x187   :  { %544 = vmatpush.msra.mxu2 %v147_v16  ;;  %v585_v16 = vmul.f32 %v583_v7, %v1915_v33  ;;  %v680_v33 = vld [vmem:[#allocation11 + $0x240] sm:$0xff]  ;;  %v723_v7 = vld [vmem:[#allocation11 + $0x188] sm:$0xff] }
 0x195   :  { %v301_v63 = vpop.permute.xlu2 %300 }
 0x196   :  { %307 = vst.msk [vmem:[#allocation2] sm:$0xff] %vm306_vm1, %v301_v63  ;;  %v184_v63 = vld [vmem:[#allocation8 + $0xe8] sm:$0xff] }
 0x197   :  { %598 = vmatpush.msrb.mxu0 %v184_v63  ;;  %625 = vmatpush.msrb.mxu1 %v184_v63  ;;  %v2064_v63 = vld [vmem:[#allocation10 + $0x7] ss:$0 sm:$0xff] }
 0x199   :  { %599 = vmatpush.msrb.mxu0 %v183_v0  ;;  %626 = vmatpush.msrb.mxu1 %v183_v0 }
 0x19b   :  { %600 = vmatpush.msrb.mxu0 %v182_v4  ;;  %627 = vmatpush.msrb.mxu1 %v182_v4  ;;  %v727_v4 = vld [vmem:[#allocation11 + $0x1e8] sm:$0xff] }
 0x19d   :  { %601 = vmatpush.msrb.mxu0 %v181_v34  ;;  %628 = vmatpush.msrb.mxu1 %v181_v34 }
 0x19f   :  { %602 = vmatpush.msrb.mxu0 %v180_v35  ;;  %629 = vmatpush.msrb.mxu1 %v180_v35  ;;  %v728_v35 = vld [vmem:[#allocation11 + $0x1f0] sm:$0xff] }
 0x1a1   :  { %603 = vmatpush.msrb.mxu0 %v179_v5  ;;  %630 = vmatpush.msrb.mxu1 %v179_v5  ;;  %v725_v5 = vld [vmem:[#allocation11 + $0x1b8] sm:$0xff] }
 0x1a3   :  { %810 = vmatpush.msra.mxu0 %v738_v45 }
 0x1a5   :  { %811 = vmatpush.msra.mxu0 %v736_v54 }
 0x1a7   :  { %v414_v14 = vpop.permute.xlu2 %413 }
 0x1b3   :  { %v340_v9 = vpop.permute.xlu0 %339 }
 0x1b4   :  { %346 = vst.msk [vmem:[#allocation2] sm:$0xff] %vm345_vm2, %v340_v9  ;;  %v579_v9 = vstv %s111_s9 }
 0x1b9   :  { %v379_v12 = vpop.permute.xlu1 %378  ;;  %v381_v19 = vpop.permute.xlu2 %380 }
 0x1ba   :  { %385 = vst.msk [vmem:[#allocation2] sm:$0xff] %vm384_vm3, %v379_v12 }
 0x1bb   :  { %420 = vst.msk [vmem:[#allocation2] sm:$0xff] %vm419_vm4, %v414_v14 }
 0x1c4   :  { %v517_v23 = vpop.permute.xlu2 %516 }
 0x1c5   :  { %v303_v17 = vpop.permute.xlu0 %302 }
 0x1c6   :  { %308 = vst.msk [vmem:[#allocation2 + $0x8] sm:$0xff] %vm306_vm1, %v303_v17  ;;  %vm976_vm1 = vcmask 261312  }
 0x1cb   :  { %v342_v18 = vpop.permute.xlu1 %341 }
 0x1cc   :  { %347 = vst.msk [vmem:[#allocation2 + $0x8] sm:$0xff] %vm345_vm2, %v342_v18  ;;  %v494_v37 = vpop.permute.xlu2 %493  ;;  %vm1015_vm2 = vcmask 326912  }
 0x1cd   :  { %386 = vst.msk [vmem:[#allocation2 + $0x8] sm:$0xff] %vm384_vm3, %v381_v19  ;;  %v453_v20 = vpop.permute.xlu0 %452  ;;  %v683_v19 = vld [vmem:[#allocation11 + $0x2d0] sm:$0xff]  ;;  %vm1054_vm3 = vcmask 392512  }
 0x1ce   :  { %459 = vst.msk [vmem:[#allocation2] sm:$0xff] %vm458_vm5, %v453_v20  ;;  %v682_v20 = vld [vmem:[#allocation11 + $0x2a0] sm:$0xff]  ;;  %684 = vmatpush.msrb.mxu2 %v683_v19  ;;  %v715_v19 = vld [vmem:[#allocation11 + $0xc8] sm:$0xff] }
 0x1d0   :  { %685 = vmatpush.msrb.mxu2 %v682_v20 }
 0x1d5   :  { %v492_v24 = vpop.permute.xlu1 %491 }
 0x1d6   :  { %498 = vst.msk [vmem:[#allocation2] sm:$0xff] %vm497_vm6, %v492_v24 }
 0x1d7   :  { %523 = vst.msk [vmem:[#allocation2] sm:$0xff] %vm522_vm7, %v517_v23 }
 0x1d8   :  { %v416_v26 = vpop.permute.xlu0 %415 }
 0x1d9   :  { %421 = vst.msk [vmem:[#allocation2 + $0x8] sm:$0xff] %vm419_vm4, %v416_v26  ;;  %v681_v26 = vld [vmem:[#allocation11 + $0x270] sm:$0xff]  ;;  %vm1093_vm4 = vcmask 458112  }
 0x1da   :  { %686 = vmatpush.msrb.mxu2 %v681_v26 }
 0x1dc   :  { %687 = vmatpush.msrb.mxu2 %v680_v33  ;;  %v712_v33 = vld [vmem:[#allocation11 + $0x70] sm:$0xff] }
 0x1de   :  { %v455_v31 = vpop.permute.xlu1 %454  ;;  %v525_v32 = vld [vmem:[#allocation2] sm:$0xff]  ;;  %688 = vmatpush.msrb.mxu2 %v679_v27 }
 0x1df   :  { %460 = vst.msk [vmem:[#allocation2 + $0x8] sm:$0xff] %vm458_vm5, %v455_v31  ;;  %545 = vmatmul.f32.vlgmr.msra.gmra.mxu2 %v525_v32  ;;  %v676_v31 = vld [vmem:[#allocation11 + $0x180] sm:$0xff]  ;;  %v675_v32 = vld [vmem:[#allocation11 + $0x150] sm:$0xff]  ;;  %vm1132_vm5 = vcmask 523712  }
 0x1e0   :  { %499 = vst.msk [vmem:[#allocation2 + $0x8] sm:$0xff] %vm497_vm6, %v494_v37  ;;  %689 = vmatpush.msrb.mxu2 %v678_v28  ;;  %v673_v37 = vld [vmem:[#allocation11 + $0xf0] sm:$0xff]  ;;  %v709_v28 = vld [vmem:[#allocation11 + $0x38] sm:$0xff]  ;;  %vm1167_vm6 = vcmask 589312  }
 0x1e2   :  { %690 = vmatpush.msrb.mxu2 %v677_v29  ;;  %v710_v29 = vld [vmem:[#allocation11 + $0x40] sm:$0xff] }
 0x1e4   :  { %691 = vmatpush.msrb.mxu2 %v676_v31 }
 0x1e6   :  { %692 = vmatpush.msrb.mxu2 %v675_v32 }
 0x1e8   :  { %693 = vmatpush.msrb.mxu2 %v674_v36  ;;  %v707_v36 = vld [vmem:[#allocation11 + $0x8] sm:$0xff] }
 0x1ea   :  { %694 = vmatpush.msrb.mxu2 %v673_v37  ;;  %v708_v37 = vld [vmem:[#allocation11 + $0x10] sm:$0xff] }
 0x1eb   :  { %v519_v47 = vpop.permute.xlu0 %518 }
 0x1ec   :  { %524 = vst.msk [vmem:[#allocation2 + $0x8] sm:$0xff] %vm522_vm7, %v519_v47  ;;  %695 = vmatpush.msrb.mxu2 %v672_v38  ;;  %vm1206_vm7 = vcmask 654912  }
 0x1ee   :  { %696 = vmatpush.msrb.mxu2 %v671_v39  ;;  %v2079_v39 = vld [vmem:[#allocation13] ss:$0 sm:$0xff] }
 0x1f0   :  { %697 = vmatpush.msrb.mxu2 %v670_v40  ;;  %v2081_v40 = vld [vmem:[#allocation13 + $0x1] ss:$0 sm:$0xff] }
 0x1f2   :  { %698 = vmatpush.msrb.mxu2 %v669_v41  ;;  %v2083_v41 = vld [vmem:[#allocation13 + $0x2] ss:$0 sm:$0xff] }
 0x1f3   :  { %v526_v48 = vld [vmem:[#allocation2 + $0x8] sm:$0xff] }
 0x1f4   :  { %548 = vmatmul.f32.gmra.mxu2 %v526_v48 }
 0x1f5   :  { %699 = vmatpush.msrb.mxu2 %v668_v42  ;;  %v2085_v42 = vld [vmem:[#allocation13 + $0x3] ss:$0 sm:$0xff] }
 0x262   :  { %v546_v44 = vpop.f32.mrf.mxu2 }
 0x263   :  { %v547_v56 = vadd.f32 %v1642_v53, %v546_v44 }
 0x265   :  { %v552_v58 = vmax.f32 %v547_v56, 0.0  ;;  %v734_v56 = vld [vmem:[#allocation11 + $0x280] sm:$0xff] }
 0x266   :  { %812 = vmatpush.msra.mxu0 %v734_v56 }
 0x267   :  { %572 = vmatmul.f32.vlgmr.msra.gmra.mxu3 %v552_v58 }
 0x268   :  { %813 = vmatpush.msra.mxu0 %v732_v60 }
 0x277   :  { %v549_v1 = vpop.f32.mrf.mxu2 }
 0x278   :  { %v550_v2 = vadd.f32 %v1642_v53, %v549_v1  ;;  %v735_v53 = vld [vmem:[#allocation11 + $0x2a8] sm:$0xff]  ;;  %v729_v1 = vld [vmem:[#allocation11 + $0x218] sm:$0xff] }
 0x279   :  { %788 = vmatpush.msrb.mxu3 %v735_v53 }
 0x27a   :  { %v553_v3 = vmax.f32 %v550_v2, 0.0  ;;  %v730_v2 = vld [vmem:[#allocation11 + $0x220] sm:$0xff] }
 0x27b   :  { %789 = vmatpush.msrb.mxu3 %v733_v55  ;;  %814 = vmatpush.msra.mxu0 %v730_v2 }
 0x27c   :  { %575 = vmatmul.f32.gmra.mxu3 %v553_v3 }
 0x27d   :  { %790 = vmatpush.msrb.mxu3 %v731_v59  ;;  %815 = vmatpush.msra.mxu0 %v728_v35 }
 0x27f   :  { %791 = vmatpush.msrb.mxu3 %v729_v1 }
 0x281   :  { %792 = vmatpush.msrb.mxu3 %v727_v4 }
 0x283   :  { %793 = vmatpush.msrb.mxu3 %v725_v5 }
 0x285   :  { %794 = vmatpush.msrb.mxu3 %v723_v7 }
 0x2ea   :  { %v573_v8 = vpop.f32.mrf.mxu3 }
 0x2eb   :  { %v574_v11 = vadd.f32 %v1643_v6, %v573_v8  ;;  %v724_v8 = vld [vmem:[#allocation11 + $0x190] sm:$0xff] }
 0x2ed   :  { %v580_v12 = vmul.f32 %v579_v9, %v574_v11 }
 0x2ef   :  { %v586_v13 = vadd.f32 %v584_v10, %v580_v12  ;;  %v721_v10 = vld [vmem:[#allocation11 + $0x158] sm:$0xff]  ;;  %v722_v12 = vld [vmem:[#allocation11 + $0x160] sm:$0xff] }
 0x2f0   :  { %795 = vmatpush.msrb.mxu3 %v721_v10 }
 0x2f1   :  { %604 = vmatmul.f32.vlgmr.msrb.gmra.mxu0 %v586_v13 }
 0x2ff   :  { %v576_v14 = vpop.f32.mrf.mxu3 }
 0x300   :  { %v577_v15 = vadd.f32 %v1643_v6, %v576_v14  ;;  %v726_v6 = vld [vmem:[#allocation11 + $0x1c0] sm:$0xff] }
 0x301   :  { %816 = vmatpush.msra.mxu0 %v726_v6 }
 0x302   :  { %v581_v17 = vmul.f32 %v579_v9, %v577_v15  ;;  %v720_v15 = vld [vmem:[#allocation11 + $0x130] sm:$0xff] }
 0x303   :  { %817 = vmatpush.msra.mxu0 %v724_v8 }
 0x304   :  { %v587_v18 = vadd.f32 %v585_v16, %v581_v17  ;;  %v717_v16 = vld [vmem:[#allocation11 + $0xf8] sm:$0xff] }
 0x305   :  { %818 = vmatpush.msra.mxu0 %v722_v12 }
 0x306   :  { %607 = vmatmul.f32.gmra.mxu0 %v587_v18 }
 0x307   :  { %819 = vmatpush.msra.mxu0 %v720_v15 }
 0x36e   :  { %v605_v21 = vpop.f32.mrf.mxu0 }
 0x36f   :  { %v611_v22 = vsub.f32 %v586_v13, %v605_v21  ;;  %v719_v13 = vld [vmem:[#allocation11 + $0x128] sm:$0xff]  ;;  %v716_v21 = vld [vmem:[#allocation11 + $0xd0] sm:$0xff] }
 0x370   :  { %796 = vmatpush.msrb.mxu3 %v719_v13 }
 0x371   :  { %v613_v23 = vmul.f32 %v611_v22, %v611_v22 }
 0x372   :  { %797 = vmatpush.msrb.mxu3 %v717_v16 }
 0x373   :  { %631 = vmatmul.f32.vlgmr.msrb.gmra.mxu1 %v613_v23 }
 0x374   :  { %798 = vmatpush.msrb.mxu3 %v715_v19 }
 0x383   :  { %v608_v30 = vpop.f32.mrf.mxu0 }
 0x384   :  { %v2058_v24 = vsub.f32 %v587_v18, %v608_v30  ;;  %v718_v18 = vld [vmem:[#allocation11 + $0x100] sm:$0xff] }
 0x385   :  { %820 = vmatpush.msra.mxu0 %v718_v18  ;;  %v714_v30 = vld [vmem:[#allocation11 + $0xa0] sm:$0xff] }
 0x386   :  { %v614_v25 = vmul.f32 %v2058_v24, %v2058_v24 }
 0x387   :  { %821 = vmatpush.msra.mxu0 %v716_v21 }
 0x388   :  { %634 = vmatmul.f32.gmra.mxu1 %v614_v25  ;;  %v711_v25 = vld [vmem:[#allocation11 + $0x68] sm:$0xff] }
 0x389   :  { %822 = vmatpush.msra.mxu0 %v714_v30 }
 0x38b   :  { %823 = vmatpush.msra.mxu0 %v712_v33 }
 0x38d   :  { %824 = vmatpush.msra.mxu0 %v710_v29 }
 0x38f   :  { %825 = vmatpush.msra.mxu0 %v708_v37 }
 0x3f0   :  { %v632_v43 = vpop.f32.mrf.mxu1 }
 0x3f1   :  { %v633_v47 = vadd.f32 0.0001, %v632_v43  ;;  %v841_v43 = vmul.f32 %v2083_v41, %v2079_v39 }
 0x3f3   :  { %1654 = vrsqrt.f32 %v633_v47  ;;  %vm644_vm9 = vweird.f32 %v633_v47 }
 0x3f9   :  { %v1655_v48 = vpop.eup %1654 }
 0x3fa   :  { %v639_v49 = vmul.f32 %v1655_v48, %v633_v47  ;;  %vm645_vm8 = vweird.f32 %v1655_v48  ;;  %v842_v47 = vmul.f32 %v2085_v42, %v2081_v40 }
 0x3fb   :  { %vm646_vm10 = vmor %vm644_vm9, %vm645_vm8  ;;  %vm1245_vm8 = vcmask 720512   ;;  %vm1284_vm9 = vcmask 786112  }
 0x3fc   :  { %v640_v50 = vmul.f32 %v1655_v48, %v639_v49  ;;  %v843_v49 = vsub.f32 %v841_v43, %v842_v47 }
 0x3fe   :  { %v641_v46 = vmul.f32 0.5, %v640_v50 }
 0x400   :  { %v642_v51 = vsub.f32 1.5, %v641_v46 }
 0x402   :  { %v643_v44 = vmul.f32 %v1655_v48, %v642_v51 }
 0x404   :  { %v647_v58 = vsel %vm646_vm10, %v1655_v48, %v643_v44  ;;  %vm1323_vm10 = vcmask 851712  }
 0x405   :  { %v635_v61 = vpop.f32.mrf.mxu1  ;;  %v658_v62 = vmul.f32 %v647_v58, %v611_v22  ;;  %v713_v22 = vld [vmem:[#allocation11 + $0x98] sm:$0xff] }
 0x406   :  { %v636_v0 = vadd.f32 0.0001, %v635_v61  ;;  %799 = vmatpush.msrb.mxu3 %v713_v22  ;;  %v846_v61 = vmul.f32 %v2085_v42, %v2079_v39 }
 0x407   :  { %v662_v3 = vmul.f32 %v2062_v57, %v658_v62  ;;  %v847_v62 = vmul.f32 %v2083_v41, %v2081_v40 }
 0x408   :  { %1656 = vrsqrt.f32 %v636_v0  ;;  %vm654_vm12 = vweird.f32 %v636_v0  ;;  %800 = vmatpush.msrb.mxu3 %v711_v25 }
 0x409   :  { %v666_v34 = vadd.f32 %v2064_v63, %v662_v3 }
 0x40a   :  { %801 = vmatpush.msrb.mxu3 %v709_v28 }
 0x40b   :  { %700 = vmatmul.f32.vlgmr.msrb.gmra.mxu2 %v666_v34 }
 0x40c   :  { %802 = vmatpush.msrb.mxu3 %v707_v36 }
 0x40e   :  { %v1657_v9 = vpop.eup %1656 }
 0x40f   :  { %v649_v11 = vmul.f32 %v1657_v9, %v636_v0  ;;  %vm655_vm11 = vweird.f32 %v1657_v9 }
 0x410   :  { %vm656_vm13 = vmor %vm654_vm12, %vm655_vm11  ;;  %vm1362_vm11 = vcmask 917312   ;;  %vm1401_vm12 = vcmask 982912  }
 0x411   :  { %v650_v14 = vmul.f32 %v1657_v9, %v649_v11 }
 0x413   :  { %v651_v17 = vmul.f32 0.5, %v650_v14 }
 0x415   :  { %v652_v20 = vsub.f32 1.5, %v651_v17 }
 0x417   :  { %v653_v23 = vmul.f32 %v1657_v9, %v652_v20 }
 0x419   :  { %v657_v26 = vsel %vm656_vm13, %v1657_v9, %v653_v23  ;;  %vm1426_vm13 = vcmask 1048512  }
 0x41a   :  { %v659_v27 = vmul.f32 %v657_v26, %v2058_v24 }
 0x41c   :  { %v663_v31 = vmul.f32 %v2062_v57, %v659_v27 }
 0x41e   :  { %v667_v32 = vadd.f32 %v2064_v63, %v663_v31  ;;  %v2199_v63 = vadd.f32 %v847_v62, %v846_v61 }
 0x420   :  { %703 = vmatmul.f32.gmra.mxu2 %v667_v32 }
 0x48e   :  { %v2071_v38 = vpop.f32.mrf.mxu2 }
 0x48f   :  { %803 = vmatmul.f32.vlgmr.msrb.gmra.mxu3 %v2071_v38  ;;  %826 = vmatmul.f32.vlgmr.msra.gmra.mxu0 %v2071_v38 }
 0x4a3   :  { %v2075_v24 = vpop.f32.mrf.mxu2 }
 0x4a4   :  { %806 = vmatmul.f32.gmra.mxu3 %v2075_v24  ;;  %829 = vmatmul.f32.gmra.mxu0 %v2075_v24 }
 0x50c   :  { %v2091_v48 = vpop.f32.mrf.mxu0 }
 0x50d   :  { %1268 = vrot.lane.b32.xlu1 %v2091_v48, %s1846_s11  ;;  %1190 = vrot.lane.b32.xlu0 %v2091_v48, %s1847_s12 }
 0x50e   :  { %1151 = vrot.lane.b32.xlu2 %v2091_v48, %s1848_s13 }
 0x512   :  { %v804_v50 = vpop.f32.mrf.mxu3 }
 0x513   :  { %v2099_v46 = vadd.f32 %v843_v49, %v804_v50 }
 0x515   :  { %1293 = vrot.lane.b32.xlu1 %v2091_v48, %s1840_s3  ;;  %1229 = vrot.lane.b32.xlu0 %v2091_v48, %s1849_s14  ;;  %860 = vst.msk [vmem:[#allocation2] sm:$0xff] %vm859_vm14, %v2099_v46  ;;  %v862_v5 = vmul.f32 %v2079_v39, %v2099_v46  ;;  %v878_v9 = vmul.f32 %v2081_v40, %v2099_v46 }
 0x516   :  { %1176 = vrot.lane.b32.xlu2 %v2091_v48, %s1842_s28 }
 0x51d   :  { %851 = vrot.lane.b32.xlu1 %v804_v50, %s1848_s13  ;;  %1254 = vrot.lane.b32.xlu0 %v2091_v48, %s1841_s5 }
 0x51e   :  { %1215 = vrot.lane.b32.xlu2 %v2091_v48, %s1843_s29 }
 0x521   :  { %v2133_v45 = vpop.f32.mrf.mxu0 }
 0x525   :  { %960 = vrot.lane.b32.xlu1 %v804_v50, %s1846_s11  ;;  %1346 = vrot.lane.b32.xlu0 %v2091_v48, %s1830_s30 }
 0x526   :  { %1307 = vrot.lane.b32.xlu2 %v2091_v48, %s1850_s4 }
 0x527   :  { %v807_v51 = vpop.f32.mrf.mxu3 }
 0x528   :  { %v2119_v52 = vadd.f32 %v843_v49, %v807_v51 }
 0x52a   :  { %861 = vst.msk [vmem:[#allocation2 + $0x8] sm:$0xff] %vm859_vm14, %v2119_v52 }
 0x52d   :  { %985 = vrot.lane.b32.xlu1 %v804_v50, %s1840_s3  ;;  %882 = vrot.lane.b32.xlu0 %v804_v50, %s1847_s12 }
 0x52e   :  { %1332 = vrot.lane.b32.xlu2 %v2091_v48, %s1833_s10 }
 0x535   :  { %1077 = vrot.lane.b32.xlu1 %v804_v50, %s1851_s15  ;;  %921 = vrot.lane.b32.xlu0 %v804_v50, %s1849_s14 }
 0x536   :  { %868 = vrot.lane.b32.xlu2 %v804_v50, %s1842_s28 }
 0x53d   :  { %1102 = vrot.lane.b32.xlu1 %v804_v50, %s1845_s8  ;;  %946 = vrot.lane.b32.xlu0 %v804_v50, %s1841_s5 }
 0x53e   :  { %907 = vrot.lane.b32.xlu2 %v804_v50, %s1843_s29 }
 0x545   :  { %1038 = vrot.lane.b32.xlu0 %v804_v50, %s1830_s30  ;;  %1153 = vrot.lane.b32.xlu1 %v2133_v45, %s1848_s13 }
 0x546   :  { %999 = vrot.lane.b32.xlu2 %v804_v50, %s1850_s4 }
 0x54d   :  { %1063 = vrot.lane.b32.xlu0 %v804_v50, %s1844_s7  ;;  %1178 = vrot.lane.b32.xlu1 %v2133_v45, %s1842_s28 }
 0x54e   :  { %1024 = vrot.lane.b32.xlu2 %v804_v50, %s1833_s10 }
 0x555   :  { %1231 = vrot.lane.b32.xlu0 %v2133_v45, %s1849_s14  ;;  %1270 = vrot.lane.b32.xlu1 %v2133_v45, %s1846_s11 }
 0x556   :  { %1116 = vrot.lane.b32.xlu2 %v804_v50, %s1836_s18 }
 0x55d   :  { %1256 = vrot.lane.b32.xlu0 %v2133_v45, %s1841_s5  ;;  %1295 = vrot.lane.b32.xlu1 %v2133_v45, %s1840_s3 }
 0x55e   :  { %1192 = vrot.lane.b32.xlu2 %v2133_v45, %s1847_s12 }
 0x565   :  { %923 = vrot.lane.b32.xlu0 %v807_v51, %s1849_s14  ;;  %853 = vrot.lane.b32.xlu1 %v807_v51, %s1848_s13 }
 0x566   :  { %1217 = vrot.lane.b32.xlu2 %v2133_v45, %s1843_s29 }
 0x568   :  { %v2158_v53 = vpop.permute.xlu2 %1151 }
 0x56d   :  { %948 = vrot.lane.b32.xlu0 %v807_v51, %s1841_s5  ;;  %870 = vrot.lane.b32.xlu1 %v807_v51, %s1842_s28 }
 0x56e   :  { %884 = vrot.lane.b32.xlu2 %v807_v51, %s1847_s12 }
 0x570   :  { %v2163_v54 = vpop.permute.xlu2 %1176 }
 0x575   :  { %1371 = vrot.lane.b32.xlu0 %v2091_v48, %s1844_s7  ;;  %962 = vrot.lane.b32.xlu1 %v807_v51, %s1846_s11 }
 0x576   :  { %909 = vrot.lane.b32.xlu2 %v807_v51, %s1843_s29 }
 0x578   :  { %v2169_v44 = vpop.permute.xlu2 %1215 }
 0x57d   :  { %1348 = vrot.lane.b32.xlu0 %v2133_v45, %s1830_s30  ;;  %987 = vrot.lane.b32.xlu1 %v807_v51, %s1840_s3 }
 0x57e   :  { %1001 = vrot.lane.b32.xlu2 %v807_v51, %s1850_s4 }
 0x57f   :  { %v2175_v55 = vpop.permute.xlu1 %1268  ;;  %v2177_v56 = vpop.permute.xlu0 %1190 }
 0x580   :  { %v2179_v57 = vpop.permute.xlu2 %1307 }
 0x585   :  { %1040 = vrot.lane.b32.xlu0 %v807_v51, %s1830_s30  ;;  %1385 = vrot.lane.b32.xlu1 %v2091_v48, %s1851_s15 }
 0x586   :  { %1026 = vrot.lane.b32.xlu2 %v807_v51, %s1833_s10 }
 0x587   :  { %v2185_v58 = vpop.permute.xlu1 %1293  ;;  %v2187_v59 = vpop.permute.xlu0 %1229 }
 0x588   :  { %v2189_v60 = vpop.permute.xlu2 %1332 }
 0x58d   :  { %1065 = vrot.lane.b32.xlu0 %v807_v51, %s1844_s7  ;;  %1079 = vrot.lane.b32.xlu1 %v807_v51, %s1851_s15 }
 0x58e   :  { %1309 = vrot.lane.b32.xlu2 %v2133_v45, %s1850_s4 }
 0x58f   :  { %v852_v0 = vpop.permute.xlu1 %851  ;;  %v2201_v1 = vpop.permute.xlu0 %1254 }
 0x590   :  { %v869_v2 = vpop.permute.xlu2 %868  ;;  %v857_v3 = vadd.f32 %v852_v0, %v2199_v63 }
 0x592   :  { %v864_v4 = vmul.f32 %v2081_v40, %v857_v3  ;;  %v876_v7 = vmul.f32 %v2079_v39, %v857_v3 }
 0x594   :  { %v866_v8 = vsub.f32 %v862_v5, %v864_v4  ;;  %v880_v11 = vadd.f32 %v878_v9, %v876_v7 }
 0x595   :  { %1104 = vrot.lane.b32.xlu0 %v807_v51, %s1845_s8  ;;  %1118 = vrot.lane.b32.xlu1 %v807_v51, %s1836_s18 }
 0x596   :  { %1334 = vrot.lane.b32.xlu2 %v2133_v45, %s1833_s10  ;;  %v874_v10 = vadd.f32 %v869_v2, %v866_v8 }
 0x597   :  { %v961_v34 = vpop.permute.xlu1 %960  ;;  %v2209_v35 = vpop.permute.xlu0 %1346 }
 0x598   :  { %v908_v6 = vpop.permute.xlu2 %907  ;;  %v901_v16 = vmul.f32 %v2079_v39, %v874_v10  ;;  %v917_v20 = vmul.f32 %v2081_v40, %v874_v10 }
 0x59d   :  { %1387 = vrot.lane.b32.xlu0 %v2133_v45, %s1851_s15  ;;  %1410 = vrot.lane.b32.xlu1 %v2091_v48, %s1845_s8 }
 0x59e   :  { %1373 = vrot.lane.b32.xlu2 %v2133_v45, %s1844_s7 }
 0x59f   :  { %v986_v12 = vpop.permute.xlu1 %985  ;;  %v883_v13 = vpop.permute.xlu0 %882 }
 0x5a0   :  { %v888_v14 = vadd.f32 %v883_v13, %v880_v11  ;;  %v1000_v15 = vpop.permute.xlu2 %999 }
 0x5a2   :  { %v903_v17 = vmul.f32 %v2081_v40, %v888_v14  ;;  %v915_v18 = vmul.f32 %v2079_v39, %v888_v14 }
 0x5a4   :  { %v905_v19 = vsub.f32 %v901_v16, %v903_v17  ;;  %v919_v21 = vadd.f32 %v917_v20, %v915_v18 }
 0x5a5   :  { %1412 = vrot.lane.b32.xlu1 %v2133_v45, %s1845_s8 }
 0x5a6   :  { %892 = vrot.lane.b32.xlu2 %v874_v10, %s1836_s18  ;;  %v913_v22 = vadd.f32 %v908_v6, %v905_v19 }
 0x5a7   :  { %v1078_v23 = vpop.permute.xlu1 %1077  ;;  %v922_v30 = vpop.permute.xlu0 %921 }
 0x5a8   :  { %v927_v25 = vadd.f32 %v922_v30, %v919_v21  ;;  %v1025_v26 = vpop.permute.xlu2 %1024  ;;  %931 = vrot.lane.b32.xlu0 %v913_v22, %s1845_s8  ;;  %v956_v28 = vmul.f32 %v2081_v40, %v913_v22  ;;  %v940_v31 = vmul.f32 %v2079_v39, %v913_v22 }
 0x5aa   :  { %v942_v33 = vmul.f32 %v2081_v40, %v927_v25  ;;  %v954_v27 = vmul.f32 %v2079_v39, %v927_v25 }
 0x5ac   :  { %v958_v29 = vadd.f32 %v956_v28, %v954_v27  ;;  %v944_v32 = vsub.f32 %v940_v31, %v942_v33 }
 0x5ae   :  { %v966_v36 = vadd.f32 %v961_v34, %v958_v29 }
 0x5af   :  { %v1103_v37 = vpop.permute.xlu1 %1102  ;;  %v947_v41 = vpop.permute.xlu0 %946 }
 0x5b0   :  { %v2234_v42 = vadd.f32 %v947_v41, %v944_v32  ;;  %v1117_v43 = vpop.permute.xlu2 %1116  ;;  %v981_v49 = vmul.f32 %v2081_v40, %v966_v36  ;;  %v993_v50 = vmul.f32 %v2079_v39, %v966_v36 }
 0x5b2   :  { %v979_v47 = vmul.f32 %v2079_v39, %v2234_v42  ;;  %v995_v46 = vmul.f32 %v2081_v40, %v2234_v42 }
 0x5b4   :  { %v983_v51 = vsub.f32 %v979_v47, %v981_v49  ;;  %v997_v61 = vadd.f32 %v995_v46, %v993_v50 }
 0x5b6   :  { %v991_v62 = vadd.f32 %v986_v12, %v983_v51  ;;  %v1005_v0 = vadd.f32 %v1000_v15, %v997_v61 }
 0x5b7   :  { %v1039_v2 = vpop.permute.xlu0 %1038  ;;  %v2242_v3 = vpop.permute.xlu1 %1153 }
 0x5b8   :  { %v1020_v4 = vmul.f32 %v2081_v40, %v1005_v0  ;;  %v1032_v34 = vmul.f32 %v2079_v39, %v1005_v0  ;;  %v1034_v5 = vmul.f32 %v2081_v40, %v991_v62  ;;  %v2247_v6 = vpop.permute.xlu2 %1192  ;;  %1009 = vrot.lane.b32.xlu2 %v991_v62, %s1844_s7  ;;  %v1018_v7 = vmul.f32 %v2079_v39, %v991_v62 }
 0x5ba   :  { %v1036_v8 = vadd.f32 %v1034_v5, %v1032_v34  ;;  %v1022_v9 = vsub.f32 %v1018_v7, %v1020_v4 }
 0x5bc   :  { %v1044_v10 = vadd.f32 %v1039_v2, %v1036_v8  ;;  %v2251_v11 = vadd.f32 %v1025_v26, %v1022_v9 }
 0x5be   :  { %v1059_v12 = vmul.f32 %v2081_v40, %v1044_v10  ;;  %v1071_v13 = vmul.f32 %v2079_v39, %v1044_v10  ;;  %v1057_v14 = vmul.f32 %v2079_v39, %v2251_v11  ;;  %v1073_v15 = vmul.f32 %v2081_v40, %v2251_v11 }
 0x5bf   :  { %v1064_v16 = vpop.permute.xlu0 %1063  ;;  %v2259_v17 = vpop.permute.xlu1 %1178 }
 0x5c0   :  { %v1061_v18 = vsub.f32 %v1057_v14, %v1059_v12  ;;  %v1075_v19 = vadd.f32 %v1073_v15, %v1071_v13  ;;  %v2261_v20 = vpop.permute.xlu2 %1217 }
 0x5c2   :  { %v2263_v21 = vadd.f32 %v1064_v16, %v1061_v18  ;;  %v1083_v22 = vadd.f32 %v1078_v23, %v1075_v19 }
 0x5c4   :  { %v1096_v30 = vmul.f32 %v2079_v39, %v2263_v21  ;;  %v1098_v25 = vmul.f32 %v2081_v40, %v1083_v22  ;;  %v1110_v26 = vmul.f32 %v2079_v39, %v1083_v22  ;;  %v1112_v33 = vmul.f32 %v2081_v40, %v2263_v21 }
 0x5c5   :  { %v863_v22 = vmul.f32 %v2079_v39, %v2119_v52 }
 0x5c6   :  { %v1100_v27 = vsub.f32 %v1096_v30, %v1098_v25  ;;  %v1114_v28 = vadd.f32 %v1112_v33, %v1110_v26 }
 0x5c7   :  { %v2271_v29 = vpop.permute.xlu0 %1231  ;;  %v2273_v31 = vpop.permute.xlu1 %1270 }
 0x5c8   :  { %v2275_v32 = vadd.f32 %v1103_v37, %v1100_v27  ;;  %v1122_v36 = vadd.f32 %v1117_v43, %v1114_v28  ;;  %v885_v23 = vpop.permute.xlu2 %884 }
 0x5ca   :  { %v1135_v41 = vmul.f32 %v2079_v39, %v2275_v32  ;;  %v1137_v47 = vmul.f32 %v2081_v40, %v1122_v36  ;;  %v1143_v49 = vmul.f32 %v2079_v39, %v1122_v36  ;;  %v1145_v50 = vmul.f32 %v2081_v40, %v2275_v32 }
 0x5cc   :  { %v1139_v46 = vsub.f32 %v1135_v41, %v1137_v47  ;;  %v1147_v51 = vadd.f32 %v1145_v50, %v1143_v49 }
 0x5ce   :  { %v2284_v61 = vadd.f32 %v1139_v46, %v2091_v48  ;;  %v1157_v37 = vadd.f32 %v2158_v53, %v1147_v51 }
 0x5cf   :  { %v2287_v62 = vpop.permute.xlu0 %1256  ;;  %v2289_v43 = vpop.permute.xlu1 %1295 }
 0x5d0   :  { %v1170_v0 = vmul.f32 %v2079_v39, %v2284_v61  ;;  %v1172_v2 = vmul.f32 %v2081_v40, %v1157_v37  ;;  %v1184_v4 = vmul.f32 %v2079_v39, %v1157_v37  ;;  %v1186_v34 = vmul.f32 %v2081_v40, %v2284_v61  ;;  %v910_v5 = vpop.permute.xlu2 %909 }
 0x5d2   :  { %v1174_v7 = vsub.f32 %v1170_v0, %v1172_v2  ;;  %v1188_v48 = vadd.f32 %v1186_v34, %v1184_v4 }
 0x5d4   :  { %v2298_v8 = vadd.f32 %v2163_v54, %v1174_v7  ;;  %v1196_v53 = vadd.f32 %v2177_v56, %v1188_v48  ;;  %v879_v56 = vmul.f32 %v2081_v40, %v2119_v52 }
 0x5d6   :  { %v1209_v9 = vmul.f32 %v2079_v39, %v2298_v8  ;;  %v1211_v10 = vmul.f32 %v2081_v40, %v1196_v53  ;;  %v1223_v12 = vmul.f32 %v2079_v39, %v1196_v53  ;;  %v1225_v13 = vmul.f32 %v2081_v40, %v2298_v8 }
 0x5d7   :  { %v924_v14 = vpop.permute.xlu0 %923  ;;  %v854_v15 = vpop.permute.xlu1 %853 }
 0x5d8   :  { %v1213_v16 = vsub.f32 %v1209_v9, %v1211_v10  ;;  %v1227_v18 = vadd.f32 %v1225_v13, %v1223_v12  ;;  %v2307_v19 = vpop.permute.xlu2 %1001  ;;  %v858_v54 = vadd.f32 %v854_v15, %v2199_v63 }
 0x5da   :  { %v865_v30 = vmul.f32 %v2081_v40, %v858_v54  ;;  %v877_v25 = vmul.f32 %v2079_v39, %v858_v54  ;;  %v2317_v26 = vadd.f32 %v2169_v44, %v1213_v16  ;;  %v1235_v33 = vadd.f32 %v2187_v59, %v1227_v18 }
 0x5dc   :  { %v881_v27 = vadd.f32 %v879_v56, %v877_v25  ;;  %v867_v28 = vsub.f32 %v863_v22, %v865_v30  ;;  %v1248_v63 = vmul.f32 %v2079_v39, %v2317_v26  ;;  %v1250_v36 = vmul.f32 %v2081_v40, %v1235_v33 }
 0x5dd   :  { %v1262_v41 = vmul.f32 %v2079_v39, %v1235_v33  ;;  %v1264_v52 = vmul.f32 %v2081_v40, %v2317_v26 }
 0x5de   :  { %v889_v47 = vadd.f32 %v885_v23, %v881_v27  ;;  %v1252_v49 = vsub.f32 %v1248_v63, %v1250_v36 }
 0x5df   :  { %v949_v50 = vpop.permute.xlu0 %948  ;;  %v871_v46 = vpop.permute.xlu1 %870  ;;  %v1266_v44 = vadd.f32 %v1264_v52, %v1262_v41 }
 0x5e0   :  { %v2326_v51 = vpop.permute.xlu2 %1026  ;;  %v875_v59 = vadd.f32 %v871_v46, %v867_v28  ;;  %v2329_v37 = vadd.f32 %v2201_v1, %v1252_v49  ;;  %v904_v0 = vmul.f32 %v2081_v40, %v889_v47  ;;  %v916_v2 = vmul.f32 %v2079_v39, %v889_v47 }
 0x5e1   :  { %v1274_v4 = vadd.f32 %v2175_v55, %v1266_v44 }
 0x5e2   :  { %v902_v34 = vmul.f32 %v2079_v39, %v875_v59  ;;  %v918_v23 = vmul.f32 %v2081_v40, %v875_v59  ;;  %894 = vrot.lane.b32.xlu1 %v875_v59, %s1836_s18  ;;  %v1287_v7 = vmul.f32 %v2079_v39, %v2329_v37  ;;  %v1303_v48 = vmul.f32 %v2081_v40, %v2329_v37 }
 0x5e3   :  { %v1289_v1 = vmul.f32 %v2081_v40, %v1274_v4  ;;  %v1301_v53 = vmul.f32 %v2079_v39, %v1274_v4 }
 0x5e4   :  { %v906_v9 = vsub.f32 %v902_v34, %v904_v0  ;;  %v920_v10 = vadd.f32 %v918_v23, %v916_v2 }
 0x5e5   :  { %v1291_v12 = vsub.f32 %v1287_v7, %v1289_v1  ;;  %v1305_v55 = vadd.f32 %v1303_v48, %v1301_v53 }
 0x5e6   :  { %v914_v13 = vadd.f32 %v910_v5, %v906_v9  ;;  %v928_v15 = vadd.f32 %v924_v14, %v920_v10 }
 0x5e7   :  { %v2344_v16 = vadd.f32 %v2185_v58, %v1291_v12  ;;  %v1313_v18 = vadd.f32 %v2179_v57, %v1305_v55  ;;  %v1372_v54 = vpop.permute.xlu0 %1371  ;;  %v963_v56 = vpop.permute.xlu1 %962 }
 0x5e8   :  { %v2347_v22 = vpop.permute.xlu2 %1309  ;;  %v955_v30 = vmul.f32 %v2079_v39, %v928_v15  ;;  %v957_v25 = vmul.f32 %v2081_v40, %v914_v13  ;;  %933 = vrot.lane.b32.xlu0 %v914_v13, %s1845_s8  ;;  %v941_v33 = vmul.f32 %v2079_v39, %v914_v13  ;;  %v943_v5 = vmul.f32 %v2081_v40, %v928_v15 }
 0x5e9   :  { %v1326_v58 = vmul.f32 %v2079_v39, %v2344_v16  ;;  %v1328_v14 = vmul.f32 %v2081_v40, %v1313_v18  ;;  %v1340_v57 = vmul.f32 %v2079_v39, %v1313_v18  ;;  %v1342_v27 = vmul.f32 %v2081_v40, %v2344_v16 }
 0x5ea   :  { %v959_v28 = vadd.f32 %v957_v25, %v955_v30  ;;  %970 = vrot.lane.b32.xlu1 %v2234_v42, %s1851_s15  ;;  %v945_v63 = vsub.f32 %v941_v33, %v943_v5 }
 0x5eb   :  { %v1330_v36 = vsub.f32 %v1326_v58, %v1328_v14  ;;  %v1344_v41 = vadd.f32 %v1342_v27, %v1340_v57 }
 0x5ec   :  { %v967_v52 = vadd.f32 %v963_v56, %v959_v28  ;;  %v953_v47 = vadd.f32 %v949_v50, %v945_v63 }
 0x5ed   :  { %v2363_v49 = vadd.f32 %v2189_v60, %v1330_v36  ;;  %v1352_v46 = vadd.f32 %v2209_v35, %v1344_v41 }
 0x5ee   :  { %v982_v44 = vmul.f32 %v2081_v40, %v967_v52  ;;  %v994_v59 = vmul.f32 %v2079_v39, %v967_v52  ;;  %972 = vrot.lane.b32.xlu2 %v953_v47, %s1851_s15  ;;  %v996_v0 = vmul.f32 %v2081_v40, %v953_v47  ;;  %v980_v42 = vmul.f32 %v2079_v39, %v953_v47 }
 0x5ef   :  { %v1365_v2 = vmul.f32 %v2079_v39, %v2363_v49  ;;  %v1367_v50 = vmul.f32 %v2081_v40, %v1352_v46  ;;  %v2374_v4 = vpop.permute.xlu0 %1348  ;;  %v988_v60 = vpop.permute.xlu1 %987  ;;  %v1379_v35 = vmul.f32 %v2079_v39, %v1352_v46  ;;  %v1381_v34 = vmul.f32 %v2081_v40, %v2363_v49 }
 0x5f0   :  { %v2379_v23 = vpop.permute.xlu2 %1334  ;;  %v984_v7 = vsub.f32 %v980_v42, %v982_v44  ;;  %1048 = vrot.lane.b32.xlu0 %v2251_v11, %s1830_s30  ;;  %v998_v48 = vadd.f32 %v996_v0, %v994_v59 }
 0x5f1   :  { %v1369_v1 = vsub.f32 %v1365_v2, %v1367_v50  ;;  %v1383_v53 = vadd.f32 %v1381_v34, %v1379_v35 }
 0x5f2   :  { %v992_v9 = vadd.f32 %v988_v60, %v984_v7  ;;  %v1006_v10 = vadd.f32 %v2307_v19, %v998_v48 }
 0x5f3   :  { %v2389_v18 = vadd.f32 %v1372_v54, %v1369_v1 }
 0x5f4   :  { %v1019_v12 = vmul.f32 %v2079_v39, %v992_v9  ;;  %1011 = vrot.lane.b32.xlu1 %v992_v9, %s1844_s7  ;;  %v1033_v55 = vmul.f32 %v2079_v39, %v1006_v10  ;;  %v1035_v13 = vmul.f32 %v2081_v40, %v992_v9  ;;  %v1021_v15 = vmul.f32 %v2081_v40, %v1006_v10 }
 0x5f5   :  { %v2398_v14 = vmul.f32 %v2079_v39, %v2389_v18 }
 0x5f6   :  { %1126 = vrot.lane.b32.xlu2 %v2275_v32, %s1850_s4  ;;  %v1037_v11 = vadd.f32 %v1035_v13, %v1033_v55  ;;  %v1023_v56 = vsub.f32 %v1019_v12, %v1021_v15 }
 0x5f7   :  { %v1041_v30 = vpop.permute.xlu0 %1040  ;;  %v1386_v25 = vpop.permute.xlu1 %1385 }
 0x5f8   :  { %v1045_v19 = vadd.f32 %v1041_v30, %v1037_v11  ;;  %v2393_v33 = vpop.permute.xlu2 %1373  ;;  %v1391_v5 = vadd.f32 %v1386_v25, %v1383_v53  ;;  %v1031_v58 = vadd.f32 %v2326_v51, %v1023_v56 }
 0x5fa   :  { %v1060_v54 = vmul.f32 %v2081_v40, %v1045_v19  ;;  %v1072_v57 = vmul.f32 %v2079_v39, %v1045_v19  ;;  %v2403_v32 = vmul.f32 %v2081_v40, %v1391_v5  ;;  %1050 = vrot.lane.b32.xlu0 %v1031_v58, %s1830_s30  ;;  %v1058_v27 = vmul.f32 %v2079_v39, %v1031_v58  ;;  %s1596_s30 = sld [smem:[#allocation7 + $0x1]] }
 0x5fb   :  { %v1074_v28 = vmul.f32 %v2081_v40, %v1031_v58 }
 0x5fc   :  { %1087 = vrot.lane.b32.xlu1 %v2263_v21, %s1833_s10  ;;  %v1062_v51 = vsub.f32 %v1058_v27, %v1060_v54  ;;  %v1408_v63 = vsub.f32 %v2398_v14, %v2403_v32 }
 0x5fd   :  { %v1076_v36 = vadd.f32 %v1074_v28, %v1072_v57 }
 0x5ff   :  { %v1066_v41 = vpop.permute.xlu0 %1065  ;;  %v1080_v52 = vpop.permute.xlu1 %1079 }
 0x600   :  { %v1070_v47 = vadd.f32 %v1066_v41, %v1062_v51  ;;  %v893_v46 = vpop.permute.xlu2 %892  ;;  %v1084_v44 = vadd.f32 %v1080_v52, %v1076_v36 }
 0x601   :  { %899 = vst.msk [vmem:[#allocation2] sm:$0xff] %vm898_vm15, %v893_v46 }
 0x602   :  { %v1099_v59 = vmul.f32 %v2081_v40, %v1084_v44  ;;  %v1111_v0 = vmul.f32 %v2079_v39, %v1084_v44  ;;  %1161 = vrot.lane.b32.xlu0 %v2284_v61, %s1840_s3  ;;  %1089 = vrot.lane.b32.xlu2 %v1070_v47, %s1833_s10  ;;  %v1097_v21 = vmul.f32 %v2079_v39, %v1070_v47  ;;  %s1486_s10 = ssub.f32 1.0, %s1596_s30 }
 0x603   :  { %v1113_v42 = vmul.f32 %v2081_v40, %v1070_v47 }
 0x604   :  { %v1101_v2 = vsub.f32 %v1097_v21, %v1099_v59 }
 0x605   :  { %v1115_v50 = vadd.f32 %v1113_v42, %v1111_v0 }
 0x607   :  { %v1105_v60 = vpop.permute.xlu0 %1104  ;;  %v1119_v35 = vpop.permute.xlu1 %1118 }
 0x608   :  { %v1109_v34 = vadd.f32 %v1105_v60, %v1101_v2  ;;  %v1123_v7 = vadd.f32 %v1119_v35, %v1115_v50 }
 0x60a   :  { %v1136_v48 = vmul.f32 %v2079_v39, %v1109_v34  ;;  %v1146_v1 = vmul.f32 %v2081_v40, %v1109_v34  ;;  %v1138_v53 = vmul.f32 %v2081_v40, %v1123_v7  ;;  %v1144_v61 = vmul.f32 %v2079_v39, %v1123_v7  ;;  %1200 = vrot.lane.b32.xlu2 %v2298_v8, %s1846_s11 }
 0x60b   :  { %1128 = vrot.lane.b32.xlu1 %v1109_v34, %s1850_s4 }
 0x60c   :  { %v1140_v9 = vsub.f32 %v1136_v48, %v1138_v53  ;;  %v1148_v10 = vadd.f32 %v1146_v1, %v1144_v61 }
 0x60e   :  { %v1142_v12 = vadd.f32 %v1140_v9, %v2133_v45  ;;  %v1158_v55 = vadd.f32 %v2242_v3, %v1148_v10 }
 0x60f   :  { %v1388_v25 = vpop.permute.xlu0 %1387  ;;  %v1411_v42 = vpop.permute.xlu1 %1410 }
 0x610   :  { %v1171_v13 = vmul.f32 %v2079_v39, %v1142_v12  ;;  %v1173_v15 = vmul.f32 %v2081_v40, %v1158_v55  ;;  %v1185_v11 = vmul.f32 %v2079_v39, %v1158_v55  ;;  %v1187_v56 = vmul.f32 %v2081_v40, %v1142_v12  ;;  %1163 = vrot.lane.b32.xlu0 %v1142_v12, %s1840_s3 }
 0x611   :  { %v1416_v7 = vadd.f32 %v1411_v42, %v1408_v63  ;;  %v770_v42 = vld [vmem:[#allocation11 + $0x2f0] sm:$0xff] }
 0x612   :  { %v1175_v30 = vsub.f32 %v1171_v13, %v1173_v15  ;;  %v1189_v8 = vadd.f32 %v1187_v56, %v1185_v11  ;;  %v1010_v12 = vpop.permute.xlu2 %1009  ;;  %v754_v56 = vld [vmem:[#allocation11 + $0x2e8] sm:$0xff]  ;;  %1460 = vmatpush.msra.mxu2 %v770_v42 }
 0x613   :  { %1239 = vrot.lane.b32.xlu1 %v2317_v26, %s1841_s5  ;;  %1433 = vmatpush.msra.mxu1 %v754_v56 }
 0x614   :  { %v1183_v45 = vadd.f32 %v2259_v17, %v1175_v30  ;;  %v1197_v3 = vadd.f32 %v2247_v6, %v1189_v8  ;;  %v753_v30 = vld [vmem:[#allocation11 + $0x2b8] sm:$0xff] }
 0x615   :  { %1434 = vmatpush.msra.mxu1 %v753_v30  ;;  %v779_v30 = vld [vmem:[#allocation11 + $0x1a8] sm:$0xff] }
 0x616   :  { %v1210_v19 = vmul.f32 %v2079_v39, %v1183_v45  ;;  %v1212_v5 = vmul.f32 %v2081_v40, %v1197_v3  ;;  %v1224_v58 = vmul.f32 %v2079_v39, %v1197_v3  ;;  %v1226_v54 = vmul.f32 %v2081_v40, %v1183_v45  ;;  %v751_v3 = vld [vmem:[#allocation11 + $0x258] sm:$0xff] }
 0x617   :  { %v1413_v9 = vpop.permute.xlu1 %1412 }
 0x618   :  { %v1214_v57 = vsub.f32 %v1210_v19, %v1212_v5  ;;  %v1228_v27 = vadd.f32 %v1226_v54, %v1224_v58  ;;  %1278 = vrot.lane.b32.xlu0 %v2329_v37, %s1849_s14  ;;  %v750_v5 = vld [vmem:[#allocation11 + $0x228] sm:$0xff]  ;;  %v749_v58 = vld [vmem:[#allocation11 + $0x1f8] sm:$0xff] }
 0x619   :  { %v748_v54 = vld [vmem:[#allocation11 + $0x1c8] sm:$0xff] }
 0x61a   :  { %v1222_v26 = vadd.f32 %v2261_v20, %v1214_v57  ;;  %v1236_v17 = vadd.f32 %v2271_v29, %v1228_v27  ;;  %v932_v28 = vpop.permute.xlu0 %931 }
 0x61b   :  { %938 = vst.msk [vmem:[#allocation2] sm:$0xff] %vm937_vm0, %v932_v28  ;;  %1202 = vrot.lane.b32.xlu1 %v1183_v45, %s1846_s11  ;;  %v745_v28 = vld [vmem:[#allocation11 + $0x138] sm:$0xff] }
 0x61c   :  { %v1249_v6 = vmul.f32 %v2079_v39, %v1222_v26  ;;  %v1251_v51 = vmul.f32 %v2081_v40, %v1236_v17  ;;  %v1263_v36 = vmul.f32 %v2079_v39, %v1236_v17  ;;  %v1265_v41 = vmul.f32 %v2081_v40, %v1222_v26  ;;  %1241 = vrot.lane.b32.xlu2 %v1222_v26, %s1841_s5  ;;  %v747_v26 = vld [vmem:[#allocation11 + $0x198] sm:$0xff]  ;;  %v746_v17 = vld [vmem:[#allocation11 + $0x168] sm:$0xff] }
 0x61e   :  { %v1253_v37 = vsub.f32 %v1249_v6, %v1251_v51  ;;  %v1267_v52 = vadd.f32 %v1265_v41, %v1263_v36  ;;  %v744_v6 = vld [vmem:[#allocation11 + $0x108] sm:$0xff]  ;;  %v743_v36 = vld [vmem:[#allocation11 + $0xd8] sm:$0xff] }
 0x61f   :  { %v742_v41 = vld [vmem:[#allocation11 + $0xa8] sm:$0xff] }
 0x620   :  { %v1261_v20 = vadd.f32 %v2287_v62, %v1253_v37  ;;  %v1275_v29 = vadd.f32 %v2273_v31, %v1267_v52  ;;  %v741_v37 = vld [vmem:[#allocation11 + $0x78] sm:$0xff] }
 0x622   :  { %v1288_v47 = vmul.f32 %v2079_v39, %v1261_v20  ;;  %v1290_v46 = vmul.f32 %v2081_v40, %v1275_v29  ;;  %v1302_v44 = vmul.f32 %v2079_v39, %v1275_v29  ;;  %v1304_v59 = vmul.f32 %v2081_v40, %v1261_v20  ;;  %1280 = vrot.lane.b32.xlu0 %v1261_v20, %s1849_s14  ;;  %v740_v29 = vld [vmem:[#allocation11 + $0x48] sm:$0xff] }
 0x623   :  { %1356 = vrot.lane.b32.xlu1 %v2363_v49, %s1847_s12 }
 0x624   :  { %v1292_v0 = vsub.f32 %v1288_v47, %v1290_v46  ;;  %v1306_v21 = vadd.f32 %v1304_v59, %v1302_v44  ;;  %1317 = vrot.lane.b32.xlu2 %v2344_v16, %s1843_s29  ;;  %v739_v47 = vld [vmem:[#allocation11 + $0x18] sm:$0xff] }
 0x626   :  { %v1300_v31 = vadd.f32 %v2289_v43, %v1292_v0  ;;  %v1314_v62 = vadd.f32 %v2347_v22, %v1306_v21 }
 0x628   :  { %v1327_v2 = vmul.f32 %v2079_v39, %v1300_v31  ;;  %v1329_v50 = vmul.f32 %v2081_v40, %v1314_v62  ;;  %v1341_v60 = vmul.f32 %v2079_v39, %v1314_v62  ;;  %v1343_v35 = vmul.f32 %v2081_v40, %v1300_v31 }
 0x62a   :  { %v1331_v34 = vsub.f32 %v1327_v2, %v1329_v50  ;;  %v1345_v49 = vadd.f32 %v1343_v35, %v1341_v60  ;;  %1395 = vrot.lane.b32.xlu0 %v2389_v18, %s1842_s28  ;;  %v769_v2 = vld [vmem:[#allocation11 + $0x2c0] sm:$0xff]  ;;  %v768_v50 = vld [vmem:[#allocation11 + $0x290] sm:$0xff] }
 0x62b   :  { %1319 = vrot.lane.b32.xlu1 %v1300_v31, %s1843_s29  ;;  %1461 = vmatpush.msra.mxu2 %v769_v2  ;;  %v767_v60 = vld [vmem:[#allocation11 + $0x260] sm:$0xff]  ;;  %v766_v35 = vld [vmem:[#allocation11 + $0x230] sm:$0xff] }
 0x62c   :  { %v1339_v43 = vadd.f32 %v2379_v23, %v1331_v34  ;;  %v1353_v16 = vadd.f32 %v2374_v4, %v1345_v49  ;;  %1420 = vrot.lane.b32.xlu2 %v1416_v7, %s1848_s13  ;;  %v765_v7 = vld [vmem:[#allocation11 + $0x200] sm:$0xff] }
 0x62d   :  { %1462 = vmatpush.msra.mxu2 %v768_v50 }
 0x62e   :  { %v1368_v22 = vmul.f32 %v2081_v40, %v1353_v16  ;;  %v1380_v48 = vmul.f32 %v2079_v39, %v1353_v16  ;;  %v1382_v1 = vmul.f32 %v2081_v40, %v1339_v43  ;;  %v1366_v14 = vmul.f32 %v2079_v39, %v1339_v43  ;;  %v764_v16 = vld [vmem:[#allocation11 + $0x1d0] sm:$0xff] }
 0x62f   :  { %1463 = vmatpush.msra.mxu2 %v767_v60 }
 0x630   :  { %v1384_v32 = vadd.f32 %v1382_v1, %v1380_v48  ;;  %v1370_v63 = vsub.f32 %v1366_v14, %v1368_v22  ;;  %v763_v22 = vld [vmem:[#allocation11 + $0x1a0] sm:$0xff]  ;;  %v762_v48 = vld [vmem:[#allocation11 + $0x170] sm:$0xff] }
 0x631   :  { %1464 = vmatpush.msra.mxu2 %v766_v35  ;;  %v761_v14 = vld [vmem:[#allocation11 + $0x140] sm:$0xff] }
 0x632   :  { %v1392_v53 = vadd.f32 %v1388_v25, %v1384_v32  ;;  %v1378_v18 = vadd.f32 %v2393_v33, %v1370_v63  ;;  %v752_v25 = vld [vmem:[#allocation11 + $0x288] sm:$0xff]  ;;  %v760_v63 = vld [vmem:[#allocation11 + $0x110] sm:$0xff] }
 0x633   :  { %1435 = vmatpush.msra.mxu1 %v752_v25  ;;  %1465 = vmatpush.msra.mxu2 %v765_v7  ;;  %v778_v25 = vld [vmem:[#allocation11 + $0x178] sm:$0xff] }
 0x634   :  { %v1407_v61 = vmul.f32 %v2081_v40, %v1392_v53  ;;  %v1405_v23 = vmul.f32 %v2079_v39, %v1378_v18  ;;  %1358 = vrot.lane.b32.xlu2 %v1339_v43, %s1847_s12  ;;  %1397 = vrot.lane.b32.xlu0 %v1378_v18, %s1842_s28  ;;  %v759_v53 = vld [vmem:[#allocation11 + $0xe0] sm:$0xff]  ;;  %v758_v18 = vld [vmem:[#allocation11 + $0xb0] sm:$0xff] }
 0x635   :  { %1436 = vmatpush.msra.mxu1 %v751_v3  ;;  %1466 = vmatpush.msra.mxu2 %v764_v16  ;;  %v777_v3 = vld [vmem:[#allocation11 + $0x148] sm:$0xff] }
 0x636   :  { %v1409_v4 = vsub.f32 %v1405_v23, %v1407_v61 }
 0x637   :  { %1437 = vmatpush.msra.mxu1 %v750_v5  ;;  %1467 = vmatpush.msra.mxu2 %v763_v22  ;;  %v775_v5 = vld [vmem:[#allocation11 + $0xe8] sm:$0xff] }
 0x638   :  { %v1417_v10 = vadd.f32 %v1413_v9, %v1409_v4  ;;  %v757_v4 = vld [vmem:[#allocation11 + $0x80] sm:$0xff]  ;;  %v756_v9 = vld [vmem:[#allocation11 + $0x50] sm:$0xff] }
 0x639   :  { %1438 = vmatpush.msra.mxu1 %v749_v58  ;;  %1468 = vmatpush.msra.mxu2 %v762_v48  ;;  %v1652_v48 = vld [vmem:[#allocation13 + $0x6] ss:$0 sm:$0xff] }
 0x63a   :  { %1422 = vrot.lane.b32.xlu1 %v1417_v10, %s1848_s13  ;;  %v755_v10 = vld [vmem:[#allocation11 + $0x20] sm:$0xff] }
 0x63b   :  { %1439 = vmatpush.msra.mxu1 %v748_v54  ;;  %1469 = vmatpush.msra.mxu2 %v761_v14 }
 0x63d   :  { %1440 = vmatpush.msra.mxu1 %v747_v26  ;;  %1470 = vmatpush.msra.mxu2 %v760_v63  ;;  %v773_v26 = vld [vmem:[#allocation11 + $0x88] sm:$0xff] }
 0x63f   :  { %1441 = vmatpush.msra.mxu1 %v746_v17  ;;  %1471 = vmatpush.msra.mxu2 %v759_v53  ;;  %v772_v17 = vld [vmem:[#allocation11 + $0x58] sm:$0xff] }
 0x641   :  { %1442 = vmatpush.msra.mxu1 %v745_v28  ;;  %1472 = vmatpush.msra.mxu2 %v758_v18  ;;  %v771_v28 = vld [vmem:[#allocation11 + $0x28] sm:$0xff] }
 0x643   :  { %1443 = vmatpush.msra.mxu1 %v744_v6  ;;  %1473 = vmatpush.msra.mxu2 %v757_v4  ;;  %v1651_v6 = vld [vmem:[#allocation13 + $0x5] ss:$0 sm:$0xff] }
 0x645   :  { %1444 = vmatpush.msra.mxu1 %v743_v36  ;;  %1474 = vmatpush.msra.mxu2 %v756_v9 }
 0x647   :  { %1445 = vmatpush.msra.mxu1 %v742_v41  ;;  %1475 = vmatpush.msra.mxu2 %v755_v10  ;;  %v1483_v41 = vstv %s1596_s30 }
 0x648   :  { %v973_v13 = vpop.permute.xlu2 %972 }
 0x649   :  { %1446 = vmatpush.msra.mxu1 %v741_v37 }
 0x64b   :  { %1447 = vmatpush.msra.mxu1 %v740_v29 }
 0x64d   :  { %1448 = vmatpush.msra.mxu1 %v739_v47 }
 0x650   :  { %v1127_v15 = vpop.permute.xlu2 %1126 }
 0x654   :  { %v895_v55 = vpop.permute.xlu1 %894 }
 0x655   :  { %900 = vst.msk [vmem:[#allocation2 + $0x8] sm:$0xff] %vm898_vm15, %v895_v55  ;;  %v785_v55 = vld [vmem:[#allocation11 + $0x2c8] sm:$0xff] }
 0x65a   :  { %v934_v33 = vpop.permute.xlu0 %933 }
 0x65b   :  { %939 = vst.msk [vmem:[#allocation2 + $0x8] sm:$0xff] %vm937_vm0, %v934_v33  ;;  %v783_v33 = vld [vmem:[#allocation11 + $0x268] sm:$0xff] }
 0x65c   :  { %v971_v39 = vpop.permute.xlu1 %970  ;;  %978 = vst.msk [vmem:[#allocation2 + $0x8] sm:$0xff] %vm976_vm1, %v973_v13  ;;  %v1090_v8 = vpop.permute.xlu2 %1089  ;;  %v784_v13 = vld [vmem:[#allocation11 + $0x298] sm:$0xff] }
 0x65d   :  { %977 = vst.msk [vmem:[#allocation2] sm:$0xff] %vm976_vm1, %v971_v39  ;;  %v782_v39 = vld [vmem:[#allocation11 + $0x238] sm:$0xff] }
 0x65e   :  { %1016 = vst.msk [vmem:[#allocation2] sm:$0xff] %vm1015_vm2, %v1010_v12  ;;  %v786_v12 = vld [vmem:[#allocation11 + $0x2f8] sm:$0xff] }
 0x65f   :  { %1492 = vmatpush.msra.mxu3 %v786_v12  ;;  %1519 = vmatpush.msrb.mxu0 %v786_v12 }
 0x660   :  { %1597 = vmatpush.msrb.mxu1 %v786_v12 }
 0x661   :  { %1493 = vmatpush.msra.mxu3 %v785_v55  ;;  %1520 = vmatpush.msrb.mxu0 %v785_v55 }
 0x662   :  { %v1049_v40 = vpop.permute.xlu0 %1048  ;;  %1598 = vmatpush.msrb.mxu1 %v785_v55 }
 0x663   :  { %1055 = vst.msk [vmem:[#allocation2] sm:$0xff] %vm1054_vm3, %v1049_v40  ;;  %1494 = vmatpush.msra.mxu3 %v784_v13  ;;  %1521 = vmatpush.msrb.mxu0 %v784_v13  ;;  %v781_v40 = vld [vmem:[#allocation11 + $0x208] sm:$0xff] }
 0x664   :  { %v1201_v27 = vpop.permute.xlu2 %1200  ;;  %1599 = vmatpush.msrb.mxu1 %v784_v13 }
 0x665   :  { %1495 = vmatpush.msra.mxu3 %v783_v33  ;;  %1522 = vmatpush.msrb.mxu0 %v783_v33 }
 0x666   :  { %v1012_v11 = vpop.permute.xlu1 %1011  ;;  %1600 = vmatpush.msrb.mxu1 %v783_v33 }
 0x667   :  { %1017 = vst.msk [vmem:[#allocation2 + $0x8] sm:$0xff] %vm1015_vm2, %v1012_v11  ;;  %1496 = vmatpush.msra.mxu3 %v782_v39  ;;  %1523 = vmatpush.msrb.mxu0 %v782_v39  ;;  %v780_v11 = vld [vmem:[#allocation11 + $0x1d8] sm:$0xff] }
 0x668   :  { %1601 = vmatpush.msrb.mxu1 %v782_v39 }
 0x669   :  { %1497 = vmatpush.msra.mxu3 %v781_v40  ;;  %1524 = vmatpush.msrb.mxu0 %v781_v40 }
 0x66a   :  { %1602 = vmatpush.msrb.mxu1 %v781_v40 }
 0x66b   :  { %1498 = vmatpush.msra.mxu3 %v780_v11  ;;  %1525 = vmatpush.msrb.mxu0 %v780_v11 }
 0x66c   :  { %v1051_v45 = vpop.permute.xlu0 %1050  ;;  %1603 = vmatpush.msrb.mxu1 %v780_v11 }
 0x66d   :  { %1056 = vst.msk [vmem:[#allocation2 + $0x8] sm:$0xff] %vm1054_vm3, %v1051_v45  ;;  %1499 = vmatpush.msra.mxu3 %v779_v30  ;;  %1526 = vmatpush.msrb.mxu0 %v779_v30 }
 0x66e   :  { %v1088_v19 = vpop.permute.xlu1 %1087  ;;  %1095 = vst.msk [vmem:[#allocation2 + $0x8] sm:$0xff] %vm1093_vm4, %v1090_v8  ;;  %1604 = vmatpush.msrb.mxu1 %v779_v30 }
 0x66f   :  { %1094 = vst.msk [vmem:[#allocation2] sm:$0xff] %vm1093_vm4, %v1088_v19  ;;  %1500 = vmatpush.msra.mxu3 %v778_v25  ;;  %v776_v19 = vld [vmem:[#allocation11 + $0x118] sm:$0xff]  ;;  %1527 = vmatpush.msrb.mxu0 %v778_v25 }
 0x670   :  { %1133 = vst.msk [vmem:[#allocation2] sm:$0xff] %vm1132_vm5, %v1127_v15  ;;  %v1650_v15 = vld [vmem:[#allocation13 + $0x4] ss:$0 sm:$0xff]  ;;  %1605 = vmatpush.msrb.mxu1 %v778_v25 }
 0x671   :  { %1501 = vmatpush.msra.mxu3 %v777_v3  ;;  %1528 = vmatpush.msrb.mxu0 %v777_v3 }
 0x672   :  { %1606 = vmatpush.msrb.mxu1 %v777_v3 }
 0x673   :  { %1502 = vmatpush.msra.mxu3 %v776_v19  ;;  %1529 = vmatpush.msrb.mxu0 %v776_v19 }
 0x674   :  { %v1162_v57 = vpop.permute.xlu0 %1161  ;;  %1607 = vmatpush.msrb.mxu1 %v776_v19 }
 0x675   :  { %1168 = vst.msk [vmem:[#allocation2] sm:$0xff] %vm1167_vm6, %v1162_v57  ;;  %1503 = vmatpush.msra.mxu3 %v775_v5  ;;  %1530 = vmatpush.msrb.mxu0 %v775_v5 }
 0x676   :  { %1207 = vst.msk [vmem:[#allocation2] sm:$0xff] %vm1206_vm7, %v1201_v27  ;;  %v1242_v52 = vpop.permute.xlu2 %1241  ;;  %1608 = vmatpush.msrb.mxu1 %v775_v5  ;;  %v774_v27 = vld [vmem:[#allocation11 + $0xb8] sm:$0xff] }
 0x677   :  { %1504 = vmatpush.msra.mxu3 %v774_v27  ;;  %1531 = vmatpush.msrb.mxu0 %v774_v27 }
 0x678   :  { %1609 = vmatpush.msrb.mxu1 %v774_v27 }
 0x679   :  { %1505 = vmatpush.msra.mxu3 %v773_v26  ;;  %1532 = vmatpush.msrb.mxu0 %v773_v26 }
 0x67a   :  { %1610 = vmatpush.msrb.mxu1 %v773_v26 }
 0x67b   :  { %1506 = vmatpush.msra.mxu3 %v772_v17  ;;  %1533 = vmatpush.msrb.mxu0 %v772_v17 }
 0x67c   :  { %1611 = vmatpush.msrb.mxu1 %v772_v17 }
 0x67d   :  { %v1129_v51 = vpop.permute.xlu1 %1128  ;;  %1507 = vmatpush.msra.mxu3 %v771_v28  ;;  %1534 = vmatpush.msrb.mxu0 %v771_v28 }
 0x67e   :  { %1134 = vst.msk [vmem:[#allocation2 + $0x8] sm:$0xff] %vm1132_vm5, %v1129_v51  ;;  %v1318_v59 = vpop.permute.xlu2 %1317  ;;  %1612 = vmatpush.msrb.mxu1 %v771_v28  ;;  %v1487_v51 = vstv %s1486_s10 }
 0x682   :  { %v1164_v20 = vpop.permute.xlu0 %1163 }
 0x683   :  { %1169 = vst.msk [vmem:[#allocation2 + $0x8] sm:$0xff] %vm1167_vm6, %v1164_v20 }
 0x685   :  { %v1240_v46 = vpop.permute.xlu1 %1239 }
 0x686   :  { %1246 = vst.msk [vmem:[#allocation2] sm:$0xff] %vm1245_vm8, %v1240_v46  ;;  %v1421_v31 = vpop.permute.xlu2 %1420 }
 0x68a   :  { %v1279_v44 = vpop.permute.xlu0 %1278 }
 0x68b   :  { %1285 = vst.msk [vmem:[#allocation2] sm:$0xff] %vm1284_vm9, %v1279_v44 }
 0x68c   :  { %1324 = vst.msk [vmem:[#allocation2] sm:$0xff] %vm1323_vm10, %v1318_v59  ;;  %v1489_v59 = vmul.f32 %v1487_v51, %v2075_v24 }
 0x68d   :  { %v1203_v0 = vpop.permute.xlu1 %1202 }
 0x68e   :  { %1208 = vst.msk [vmem:[#allocation2 + $0x8] sm:$0xff] %vm1206_vm7, %v1203_v0  ;;  %v1359_v43 = vpop.permute.xlu2 %1358 }
 0x68f   :  { %1247 = vst.msk [vmem:[#allocation2 + $0x8] sm:$0xff] %vm1245_vm8, %v1242_v52  ;;  %v1488_v52 = vmul.f32 %v1487_v51, %v2071_v38 }
 0x694   :  { %v1281_v21 = vpop.permute.xlu0 %1280 }
 0x695   :  { %v1357_v62 = vpop.permute.xlu1 %1356  ;;  %1286 = vst.msk [vmem:[#allocation2 + $0x8] sm:$0xff] %vm1284_vm9, %v1281_v21 }
 0x696   :  { %1363 = vst.msk [vmem:[#allocation2] sm:$0xff] %vm1362_vm11, %v1357_v62 }
 0x69c   :  { %v1396_v34 = vpop.permute.xlu0 %1395 }
 0x69d   :  { %1402 = vst.msk [vmem:[#allocation2] sm:$0xff] %vm1401_vm12, %v1396_v34  ;;  %v1320_v49 = vpop.permute.xlu1 %1319 }
 0x69e   :  { %1427 = vst.msk [vmem:[#allocation2] sm:$0xff] %vm1426_vm13, %v1421_v31 }
 0x69f   :  { %1325 = vst.msk [vmem:[#allocation2 + $0x8] sm:$0xff] %vm1323_vm10, %v1320_v49 }
 0x6a0   :  { %1364 = vst.msk [vmem:[#allocation2 + $0x8] sm:$0xff] %vm1362_vm11, %v1359_v43 }
 0x6a5   :  { %v1429_v1 = vld [vmem:[#allocation2] sm:$0xff] }
 0x6a6   :  { %1449 = vmatmul.f32.vlgmr.msra.gmra.mxu1 %v1429_v1  ;;  %v1398_v32 = vpop.permute.xlu0 %1397 }
 0x6a7   :  { %1403 = vst.msk [vmem:[#allocation2 + $0x8] sm:$0xff] %vm1401_vm12, %v1398_v32  ;;  %v1653_v32 = vld [vmem:[#allocation13 + $0x7] ss:$0 sm:$0xff] }
 0x6ac   :  { %v1423_v61 = vpop.permute.xlu1 %1422 }
 0x6ad   :  { %1428 = vst.msk [vmem:[#allocation2 + $0x8] sm:$0xff] %vm1426_vm13, %v1423_v61 }
 0x6b4   :  { %v1430_v23 = vld [vmem:[#allocation2 + $0x8] sm:$0xff] }
 0x6b5   :  { %1452 = vmatmul.f32.gmra.mxu1 %v1430_v23 }
 0x723   :  { %v1450_v56 = vpop.f32.mrf.mxu1 }
 0x724   :  { %v1451_v8 = vadd.f32 %v1650_v15, %v1450_v56 }
 0x726   :  { %v1456_v45 = vmax.f32 %v1451_v8, 0.0 }
 0x728   :  { %1476 = vmatmul.f32.vlgmr.msra.gmra.mxu2 %v1456_v45 }
 0x732   :  { %v1453_v58 = vpop.f32.mrf.mxu1 }
 0x733   :  { %v1454_v54 = vadd.f32 %v1650_v15, %v1453_v58 }
 0x735   :  { %v1457_v57 = vmax.f32 %v1454_v54, 0.0 }
 0x737   :  { %1479 = vmatmul.f32.gmra.mxu2 %v1457_v57 }
 0x7ab   :  { %v1477_v36 = vpop.f32.mrf.mxu2 }
 0x7ac   :  { %v1478_v37 = vadd.f32 %v1651_v6, %v1477_v36 }
 0x7ae   :  { %v1484_v20 = vmul.f32 %v1483_v41, %v1478_v37 }
 0x7b0   :  { %v1490_v29 = vadd.f32 %v1488_v52, %v1484_v20 }
 0x7b2   :  { %1508 = vmatmul.f32.vlgmr.msra.gmra.mxu3 %v1490_v29 }
 0x7ba   :  { %v1480_v47 = vpop.f32.mrf.mxu2 }
 0x7bb   :  { %v1481_v46 = vadd.f32 %v1651_v6, %v1480_v47 }
 0x7bd   :  { %v1485_v44 = vmul.f32 %v1483_v41, %v1481_v46 }
 0x7bf   :  { %v1491_v0 = vadd.f32 %v1489_v59, %v1485_v44 }
 0x7c1   :  { %1511 = vmatmul.f32.gmra.mxu3 %v1491_v0 }
 0x835   :  { %v1509_v21 = vpop.f32.mrf.mxu3 }
 0x836   :  { %v1515_v31 = vsub.f32 %v1490_v29, %v1509_v21 }
 0x838   :  { %v1517_v62 = vmul.f32 %v1515_v31, %v1515_v31 }
 0x83a   :  { %1535 = vmatmul.f32.vlgmr.msrb.gmra.mxu0 %v1517_v62 }
 0x844   :  { %v1512_v42 = vpop.f32.mrf.mxu3 }
 0x845   :  { %v1516_v2 = vsub.f32 %v1491_v0, %v1512_v42 }
 0x847   :  { %v1518_v50 = vmul.f32 %v1516_v2, %v1516_v2 }
 0x849   :  { %1538 = vmatmul.f32.vlgmr.msrb.gmra.mxu1 %v1518_v50 }
 0x8b7   :  { %v1536_v60 = vpop.f32.mrf.mxu0 }
 0x8b8   :  { %v1537_v38 = vadd.f32 0.0001, %v1536_v60 }
 0x8ba   :  { %1658 = vrsqrt.f32 %v1537_v38  ;;  %vm1548_vm15 = vweird.f32 %v1537_v38 }
 0x8c0   :  { %v1659_v35 = vpop.eup %1658 }
 0x8c1   :  { %v1543_v34 = vmul.f32 %v1659_v35, %v1537_v38  ;;  %vm1549_vm14 = vweird.f32 %v1659_v35 }
 0x8c2   :  { %vm1550_vm0 = vmor %vm1548_vm15, %vm1549_vm14 }
 0x8c3   :  { %v1544_v49 = vmul.f32 %v1659_v35, %v1543_v34 }
 0x8c5   :  { %v1545_v7 = vmul.f32 0.5, %v1544_v49 }
 0x8c6   :  { %v1539_v43 = vpop.f32.mrf.mxu1 }
 0x8c7   :  { %v1546_v16 = vsub.f32 1.5, %v1545_v7  ;;  %v1540_v24 = vadd.f32 0.0001, %v1539_v43 }
 0x8c9   :  { %v1547_v22 = vmul.f32 %v1659_v35, %v1546_v16  ;;  %1660 = vrsqrt.f32 %v1540_v24  ;;  %vm1558_vm2 = vweird.f32 %v1540_v24 }
 0x8cb   :  { %v1551_v1 = vsel %vm1550_vm0, %v1659_v35, %v1547_v22 }
 0x8cc   :  { %v1562_v14 = vmul.f32 %v1551_v1, %v1515_v31 }
 0x8ce   :  { %v1566_v63 = vmul.f32 %v1652_v48, %v1562_v14 }
 0x8cf   :  { %v1661_v53 = vpop.eup %1660 }
 0x8d0   :  { %v1553_v18 = vmul.f32 %v1661_v53, %v1540_v24  ;;  %v1570_v61 = vadd.f32 %v1653_v32, %v1566_v63  ;;  %vm1559_vm1 = vweird.f32 %v1661_v53 }
 0x8d1   :  { %vm1560_vm3 = vmor %vm1558_vm2, %vm1559_vm1 }
 0x8d2   :  { %v1554_v23 = vmul.f32 %v1661_v53, %v1553_v18  ;;  %1572 = vst [vmem:[#allocation14] sm:$0xff] %v1570_v61 }
 0x8d4   :  { %v1555_v4 = vmul.f32 0.5, %v1554_v23 }
 0x8d6   :  { %v1556_v9 = vsub.f32 1.5, %v1555_v4 }
 0x8d8   :  { %v1557_v10 = vmul.f32 %v1661_v53, %v1556_v9 }
 0x8da   :  { %v1561_v12 = vsel %vm1560_vm3, %v1661_v53, %v1557_v10 }
 0x8db   :  { %v1563_v55 = vmul.f32 %v1561_v12, %v1516_v2 }
 0x8dd   :  { %v1567_v13 = vmul.f32 %v1652_v48, %v1563_v55 }
 0x8df   :  { %v1571_v33 = vadd.f32 %v1653_v32, %v1567_v13 }
 0x8e1   :  { %1573 = vst [vmem:[#allocation14 + $0x8] sm:$0xff] %v1571_v33 }
 0x8e2   :  { %1586 = dma.vmem_to_hbm [thread:$0]  %s1579_s19, 256, %s1581_s0, [#allocation5], %s1835_s17, %s1835_s17, %s1836_s18  }
 0x8e3   :  { %1826 = dma.done.wait [#allocation5], 256  }
 0x8e4   :  { %1827 = vsyncadd [#allocation5], 4294967040 }
 0x8e5   :  { %1591 = vsyncpa [#allocation4], 1 }
 0x8e6   :  { %1592 = vsyncpa [#allocation9], 1 }
 0x8e7   :  { %1593 = vsyncpa [#allocation12], 1 }
 0x8e8   :  { %1594 = vsyncpa [#allocation5], 1 }
 0x8e9   :  { %1595 = vsyncpa [#allocation6], 1 }

</bundles_post_ra>
